<compile_context>
chip_gen: v7x
topology: tpu7x:2x2x1
jax: 0.10.0
libtpu: 0.0.40
codegen_flags: <defaults>
</compile_context>

<pallas_src>
import jax
import jax.numpy as jnp
from jax.experimental import pallas as pl
from jax.experimental.pallas import tpu as pltpu  # noqa: F401  (kept for parity)


def _pad_rows(n):
    return ((n + 7) // 8) * 8


# ----------------------------------------------------------------------------
# Fused kernel
# ----------------------------------------------------------------------------
def make_fused_unet_kernel(T, B, L, H1, H2, H3):
    # Static row offsets inside the packed parameter slabs (all 8-aligned).
    # slab32 (lane width 4*H1 == H3 == 32): wx1 | wh1 | b1 | wfc | bfc
    o_wx1 = 0
    o_wh1 = o_wx1 + _pad_rows(L)
    o_b1 = o_wh1 + _pad_rows(H1)
    o_wfc = o_b1 + _pad_rows(1)
    o_bfc = o_wfc + _pad_rows(H3)
    # slab64 (lane width 4*H2 == 64): wx2 | wh2 | b2
    o_wx2 = 0
    o_wh2 = o_wx2 + _pad_rows(H1)
    o_b2 = o_wh2 + _pad_rows(H2)
    # slab128 (lane width 4*H3 == 128): wx3 | wh3 | b3
    o_wx3 = 0
    o_wh3 = o_wx3 + _pad_rows(H2)
    o_b3 = o_wh3 + _pad_rows(H3)

    def lstm_layer(gx, wh, H):
        """Serial LSTM recurrence; gx = X@Wx + b precomputed for all steps.

        gx : (T*B, 4H) value, rows t*B:(t+1)*B belong to time step t.
        wh : (H, 4H) value.
        Returns relu(h_t) stacked to (T*B, H), kept in vregs (no VMEM scratch).
        """
        h = jnp.zeros((B, H), jnp.float32)
        c = jnp.zeros((B, H), jnp.float32)
        ys = []
        for t in range(T):  # static unroll (T is tiny)
            gates = gx[t * B:(t + 1) * B, :] + jnp.dot(
                h, wh, preferred_element_type=jnp.float32)   # (B, 4H): i,f,g,o
            sig = jax.nn.sigmoid(gates)          # one EUP push over full vreg
            i = sig[:, 0 * H:1 * H]
            f = sig[:, 1 * H:2 * H]
            o = sig[:, 3 * H:4 * H]
            g = jnp.tanh(gates[:, 2 * H:3 * H])  # tanh only on the g slice
            c = f * c + i * g
            h = o * jnp.tanh(c)
            ys.append(jnp.maximum(h, 0.0))       # ReLU on emitted output only
        return jnp.concatenate(ys, axis=0)       # (T*B, H), stays in registers

    def kernel(x_ref, p32_ref, p64_ref, p128_ref, o_ref):
        # ---- unpack packed parameter slabs with static row slices
        wx1 = p32_ref[o_wx1:o_wx1 + L, :]
        wh1 = p32_ref[o_wh1:o_wh1 + H1, :]
        b1 = p32_ref[o_b1:o_b1 + 1, :]
        wfc = p32_ref[o_wfc:o_wfc + H3, :]
        bfc = p32_ref[o_bfc:o_bfc + 1, :]

        wx2 = p64_ref[o_wx2:o_wx2 + H1, :]
        wh2 = p64_ref[o_wh2:o_wh2 + H2, :]
        b2 = p64_ref[o_b2:o_b2 + 1, :]

        wx3 = p128_ref[o_wx3:o_wx3 + H2, :]
        wh3 = p128_ref[o_wh3:o_wh3 + H3, :]
        b3 = p128_ref[o_b3:o_b3 + 1, :]

        # ---- layer 1: hoisted input-to-gates matmul over the whole sequence
        gx1 = jnp.dot(x_ref[...], wx1, preferred_element_type=jnp.float32) + b1
        y1 = lstm_layer(gx1, wh1, H1)            # (T*B, H1) in vregs

        # ---- layer 2
        gx2 = jnp.dot(y1, wx2, preferred_element_type=jnp.float32) + b2
        y2 = lstm_layer(gx2, wh2, H2)            # (T*B, H2)

        # ---- layer 3
        gx3 = jnp.dot(y2, wx3, preferred_element_type=jnp.float32) + b3
        y3 = lstm_layer(gx3, wh3, H3)            # (T*B, H3)

        # ---- attention gate: AdaptiveAvgPool1d(32) on a 32-wide feature dim
        #      is the identity; a = y @ Wfc^T + b ; out = y * a.
        a = jnp.dot(y3, wfc, preferred_element_type=jnp.float32) + bfc
        o_ref[...] = y3 * a                      # single slab store

    return kernel


# ----------------------------------------------------------------------------
# Wrapper
# ----------------------------------------------------------------------------
def _pack_slab(blocks):
    """Stack 2-D blocks (same lane width) with rows padded to multiples of 8."""
    parts = []
    for blk in blocks:
        rows = _pad_rows(blk.shape[0])
        pad = rows - blk.shape[0]
        if pad:
            blk = jnp.concatenate(
                [blk, jnp.zeros((pad, blk.shape[1]), jnp.float32)], axis=0)
        parts.append(blk)
    return jnp.concatenate(parts, axis=0)


def unet_forward_pallas(x, params):
    (wx1, wh1, b1), (wx2, wh2, b2), (wx3, wh3, b3), (wfc, bfc) = params
    T, B, L = x.shape
    H1, H2, H3 = wh1.shape[0], wh2.shape[0], wh3.shape[0]

    x2d = x.reshape(T * B, L)                      # row t*B + b == x[t, b]
    slab32 = _pack_slab([wx1, wh1, b1, wfc, bfc])  # lane width 32
    slab64 = _pack_slab([wx2, wh2, b2])            # lane width 64
    slab128 = _pack_slab([wx3, wh3, b3])           # lane width 128

    out2d = pl.pallas_call(
        make_fused_unet_kernel(T, B, L, H1, H2, H3),
        out_shape=jax.ShapeDtypeStruct((T * B, H3), jnp.float32),
        # no grid / no BlockSpecs: single invocation, whole (tiny) arrays in VMEM
    )(x2d, slab32, slab64, slab128)

    return out2d.reshape(T, B, H3)


unet_forward = jax.jit(unet_forward_pallas)


# ----------------------------------------------------------------------------
# Parameters (deterministic, PyTorch-LSTM-style uniform init)
# ----------------------------------------------------------------------------
def init_lstm_params(key, din, h):
    bound = 1.0 / jnp.sqrt(h)
    k1, k2, k3, k4 = jax.random.split(key, 4)
    w_ih = jax.random.uniform(k1, (4 * h, din), jnp.float32, -bound, bound)
    w_hh = jax.random.uniform(k2, (4 * h, h), jnp.float32, -bound, bound)
    b_ih = jax.random.uniform(k3, (4 * h,), jnp.float32, -bound, bound)
    b_hh = jax.random.uniform(k4, (4 * h,), jnp.float32, -bound, bound)
    # pre-transpose / pre-combine for the kernel
    return w_ih.T, w_hh.T, (b_ih + b_hh)[None, :]


def init_linear_params(key, fin, fout):
    bound = 1.0 / jnp.sqrt(fin)
    k1, k2 = jax.random.split(key)
    w = jax.random.uniform(k1, (fout, fin), jnp.float32, -bound, bound)
    b = jax.random.uniform(k2, (fout,), jnp.float32, -bound, bound)
    return w.T, b[None, :]


# ----------------------------------------------------------------------------
# Pure-JAX reference
# ----------------------------------------------------------------------------
def _lstm_ref(x, wx, wh, b):
    T, B, _ = x.shape
    H = wh.shape[0]

    def step(carry, xt):
        h, c = carry
        gates = xt @ wx + h @ wh + b
        i = jax.nn.sigmoid(gates[:, 0 * H:1 * H])
        f = jax.nn.sigmoid(gates[:, 1 * H:2 * H])
        g = jnp.tanh(gates[:, 2 * H:3 * H])
        o = jax.nn.sigmoid(gates[:, 3 * H:4 * H])
        c = f * c + i * g
        h = o * jnp.tanh(c)
        return (h, c), jnp.maximum(h, 0.0)

    init = (jnp.zeros((B, H), jnp.float32), jnp.zeros((B, H), jnp.float32))
    _, ys = jax.lax.scan(step, init, x)
    return ys


def unet_forward_ref(x, params):
    (wx1, wh1, b1), (wx2, wh2, b2), (wx3, wh3, b3), (wfc, bfc) = params
    x = _lstm_ref(x, wx1, wh1, b1)
    x = _lstm_ref(x, wx2, wh2, b2)
    x = _lstm_ref(x, wx3, wh3, b3)
    a = x @ wfc + bfc   # AdaptiveAvgPool1d(32) over a 32-wide feature dim == identity
    return x * a


# ----------------------------------------------------------------------------
if __name__ == "__main__":
    T, B, L = 8, 2, 16          # seq len, batch, param['len']
    H1, H2, H3 = 8, 16, 32      # feature_size: 8 -> 16 -> 32

    root = jax.random.PRNGKey(0)
    kx, k1, k2, k3, k4 = jax.random.split(root, 5)

    x = jax.random.normal(kx, (T, B, L), jnp.float32)

    params = (
        init_lstm_params(k1, L, H1),
        init_lstm_params(k2, H1, H2),
        init_lstm_params(k3, H2, H3),
        init_linear_params(k4, H3, H3),
    )

    out = unet_forward(x, params)
    out = jax.block_until_ready(out)

    ref = unet_forward_ref(x, params)
    assert out.shape == (T, B, H3)
    assert jnp.allclose(out, ref, atol=2e-5, rtol=2e-5), "mismatch vs reference"

    print("KERNEL_OK")
</pallas_src>

<mosaic_0001>
module attributes {stable_mosaic.version = 11 : i64} {
  func.func @kernel(%arg0: memref<16x16xf32, #tpu.memory_space<vmem>>, %arg1: memref<72x32xf32, #tpu.memory_space<vmem>>, %arg2: memref<32x64xf32, #tpu.memory_space<vmem>>, %arg3: memref<56x128xf32, #tpu.memory_space<vmem>>, %arg4: memref<16x32xf32, #tpu.memory_space<vmem>>) attributes {dimension_semantics = [], scalar_prefetch = 0 : i64, scratch_operands = 0 : i64, tpu.core_type = #tpu.core_type<tc>} {
    %c0 = arith.constant 0 : index
    %c0_0 = arith.constant 0 : index
    %0 = vector.load %arg1[%c0, %c0_0] : memref<72x32xf32, #tpu.memory_space<vmem>>, vector<16x32xf32>
    %c16 = arith.constant 16 : index
    %c0_1 = arith.constant 0 : index
    %1 = vector.load %arg1[%c16, %c0_1] : memref<72x32xf32, #tpu.memory_space<vmem>>, vector<8x32xf32>
    %c24 = arith.constant 24 : index
    %c0_2 = arith.constant 0 : index
    %2 = vector.load %arg1[%c24, %c0_2] : memref<72x32xf32, #tpu.memory_space<vmem>>, vector<1x32xf32>
    %c32 = arith.constant 32 : index
    %c0_3 = arith.constant 0 : index
    %3 = vector.load %arg1[%c32, %c0_3] : memref<72x32xf32, #tpu.memory_space<vmem>>, vector<32x32xf32>
    %c64 = arith.constant 64 : index
    %c0_4 = arith.constant 0 : index
    %4 = vector.load %arg1[%c64, %c0_4] : memref<72x32xf32, #tpu.memory_space<vmem>>, vector<1x32xf32>
    %c0_5 = arith.constant 0 : index
    %c0_6 = arith.constant 0 : index
    %5 = vector.load %arg2[%c0_5, %c0_6] : memref<32x64xf32, #tpu.memory_space<vmem>>, vector<8x64xf32>
    %c8 = arith.constant 8 : index
    %c0_7 = arith.constant 0 : index
    %6 = vector.load %arg2[%c8, %c0_7] : memref<32x64xf32, #tpu.memory_space<vmem>>, vector<16x64xf32>
    %c24_8 = arith.constant 24 : index
    %c0_9 = arith.constant 0 : index
    %7 = vector.load %arg2[%c24_8, %c0_9] : memref<32x64xf32, #tpu.memory_space<vmem>>, vector<1x64xf32>
    %c0_10 = arith.constant 0 : index
    %c0_11 = arith.constant 0 : index
    %8 = vector.load %arg3[%c0_10, %c0_11] : memref<56x128xf32, #tpu.memory_space<vmem>>, vector<16x128xf32>
    %c16_12 = arith.constant 16 : index
    %c0_13 = arith.constant 0 : index
    %9 = vector.load %arg3[%c16_12, %c0_13] : memref<56x128xf32, #tpu.memory_space<vmem>>, vector<32x128xf32>
    %c48 = arith.constant 48 : index
    %c0_14 = arith.constant 0 : index
    %10 = vector.load %arg3[%c48, %c0_14] : memref<56x128xf32, #tpu.memory_space<vmem>>, vector<1x128xf32>
    %c0_15 = arith.constant 0 : index
    %c0_16 = arith.constant 0 : index
    %11 = vector.load %arg0[%c0_15, %c0_16] : memref<16x16xf32, #tpu.memory_space<vmem>>, vector<16x16xf32>
    %cst = arith.constant dense<0.000000e+00> : vector<16x32xf32>
    %12 = tpu.matmul %11, %0, %cst {dimension_numbers = #tpu.dot_dimension_numbers<[1], [0], [0], [1], [0, 0, 1, 1], [], []>} : vector<16x16xf32>, vector<16x32xf32>, vector<16x32xf32> -> vector<16x32xf32>
    %13 = vector.broadcast %2 : vector<1x32xf32> to vector<16x32xf32>
    %14 = arith.addf %12, %13 : vector<16x32xf32>
    %cst_17 = arith.constant 0.000000e+00 : f32
    %15 = vector.broadcast %cst_17 : f32 to vector<2x8xf32>
    %cst_18 = arith.constant 0.000000e+00 : f32
    %16 = vector.broadcast %cst_18 : f32 to vector<2x8xf32>
    %17 = vector.extract_strided_slice %14 {offsets = [0, 0], sizes = [2, 32], strides = [1, 1]} : vector<16x32xf32> to vector<2x32xf32>
    %cst_19 = arith.constant dense<0.000000e+00> : vector<2x32xf32>
    %18 = tpu.matmul %15, %1, %cst_19 {dimension_numbers = #tpu.dot_dimension_numbers<[1], [0], [0], [1], [0, 0, 1, 1], [], []>} : vector<2x8xf32>, vector<8x32xf32>, vector<2x32xf32> -> vector<2x32xf32>
    %19 = arith.addf %17, %18 : vector<2x32xf32>
    %20 = arith.negf %19 : vector<2x32xf32>
    %21 = math.exp %20 : vector<2x32xf32>
    %cst_20 = arith.constant 1.000000e+00 : f32
    %22 = vector.broadcast %cst_20 : f32 to vector<2x32xf32>
    %23 = arith.addf %22, %21 : vector<2x32xf32>
    %24 = arith.divf %22, %23 : vector<2x32xf32>
    %25 = vector.extract_strided_slice %24 {offsets = [0, 0], sizes = [2, 8], strides = [1, 1]} : vector<2x32xf32> to vector<2x8xf32>
    %26 = vector.extract_strided_slice %24 {offsets = [0, 8], sizes = [2, 8], strides = [1, 1]} : vector<2x32xf32> to vector<2x8xf32>
    %27 = vector.extract_strided_slice %24 {offsets = [0, 24], sizes = [2, 8], strides = [1, 1]} : vector<2x32xf32> to vector<2x8xf32>
    %28 = vector.extract_strided_slice %19 {offsets = [0, 16], sizes = [2, 8], strides = [1, 1]} : vector<2x32xf32> to vector<2x8xf32>
    %29 = math.tanh %28 : vector<2x8xf32>
    %30 = arith.mulf %26, %16 : vector<2x8xf32>
    %31 = arith.mulf %25, %29 : vector<2x8xf32>
    %32 = arith.addf %30, %31 : vector<2x8xf32>
    %33 = math.tanh %32 : vector<2x8xf32>
    %34 = arith.mulf %27, %33 : vector<2x8xf32>
    %cst_21 = arith.constant 0.000000e+00 : f32
    %35 = vector.broadcast %cst_21 : f32 to vector<2x8xf32>
    %36 = arith.maximumf %34, %35 : vector<2x8xf32>
    %37 = vector.extract_strided_slice %14 {offsets = [2, 0], sizes = [2, 32], strides = [1, 1]} : vector<16x32xf32> to vector<2x32xf32>
    %cst_22 = arith.constant dense<0.000000e+00> : vector<2x32xf32>
    %38 = tpu.matmul %34, %1, %cst_22 {dimension_numbers = #tpu.dot_dimension_numbers<[1], [0], [0], [1], [0, 0, 1, 1], [], []>} : vector<2x8xf32>, vector<8x32xf32>, vector<2x32xf32> -> vector<2x32xf32>
    %39 = arith.addf %37, %38 : vector<2x32xf32>
    %40 = arith.negf %39 : vector<2x32xf32>
    %41 = math.exp %40 : vector<2x32xf32>
    %cst_23 = arith.constant 1.000000e+00 : f32
    %42 = vector.broadcast %cst_23 : f32 to vector<2x32xf32>
    %43 = arith.addf %42, %41 : vector<2x32xf32>
    %44 = arith.divf %42, %43 : vector<2x32xf32>
    %45 = vector.extract_strided_slice %44 {offsets = [0, 0], sizes = [2, 8], strides = [1, 1]} : vector<2x32xf32> to vector<2x8xf32>
    %46 = vector.extract_strided_slice %44 {offsets = [0, 8], sizes = [2, 8], strides = [1, 1]} : vector<2x32xf32> to vector<2x8xf32>
    %47 = vector.extract_strided_slice %44 {offsets = [0, 24], sizes = [2, 8], strides = [1, 1]} : vector<2x32xf32> to vector<2x8xf32>
    %48 = vector.extract_strided_slice %39 {offsets = [0, 16], sizes = [2, 8], strides = [1, 1]} : vector<2x32xf32> to vector<2x8xf32>
    %49 = math.tanh %48 : vector<2x8xf32>
    %50 = arith.mulf %46, %32 : vector<2x8xf32>
    %51 = arith.mulf %45, %49 : vector<2x8xf32>
    %52 = arith.addf %50, %51 : vector<2x8xf32>
    %53 = math.tanh %52 : vector<2x8xf32>
    %54 = arith.mulf %47, %53 : vector<2x8xf32>
    %cst_24 = arith.constant 0.000000e+00 : f32
    %55 = vector.broadcast %cst_24 : f32 to vector<2x8xf32>
    %56 = arith.maximumf %54, %55 : vector<2x8xf32>
    %57 = vector.extract_strided_slice %14 {offsets = [4, 0], sizes = [2, 32], strides = [1, 1]} : vector<16x32xf32> to vector<2x32xf32>
    %cst_25 = arith.constant dense<0.000000e+00> : vector<2x32xf32>
    %58 = tpu.matmul %54, %1, %cst_25 {dimension_numbers = #tpu.dot_dimension_numbers<[1], [0], [0], [1], [0, 0, 1, 1], [], []>} : vector<2x8xf32>, vector<8x32xf32>, vector<2x32xf32> -> vector<2x32xf32>
    %59 = arith.addf %57, %58 : vector<2x32xf32>
    %60 = arith.negf %59 : vector<2x32xf32>
    %61 = math.exp %60 : vector<2x32xf32>
    %cst_26 = arith.constant 1.000000e+00 : f32
    %62 = vector.broadcast %cst_26 : f32 to vector<2x32xf32>
    %63 = arith.addf %62, %61 : vector<2x32xf32>
    %64 = arith.divf %62, %63 : vector<2x32xf32>
    %65 = vector.extract_strided_slice %64 {offsets = [0, 0], sizes = [2, 8], strides = [1, 1]} : vector<2x32xf32> to vector<2x8xf32>
    %66 = vector.extract_strided_slice %64 {offsets = [0, 8], sizes = [2, 8], strides = [1, 1]} : vector<2x32xf32> to vector<2x8xf32>
    %67 = vector.extract_strided_slice %64 {offsets = [0, 24], sizes = [2, 8], strides = [1, 1]} : vector<2x32xf32> to vector<2x8xf32>
    %68 = vector.extract_strided_slice %59 {offsets = [0, 16], sizes = [2, 8], strides = [1, 1]} : vector<2x32xf32> to vector<2x8xf32>
    %69 = math.tanh %68 : vector<2x8xf32>
    %70 = arith.mulf %66, %52 : vector<2x8xf32>
    %71 = arith.mulf %65, %69 : vector<2x8xf32>
    %72 = arith.addf %70, %71 : vector<2x8xf32>
    %73 = math.tanh %72 : vector<2x8xf32>
    %74 = arith.mulf %67, %73 : vector<2x8xf32>
    %cst_27 = arith.constant 0.000000e+00 : f32
    %75 = vector.broadcast %cst_27 : f32 to vector<2x8xf32>
    %76 = arith.maximumf %74, %75 : vector<2x8xf32>
    %77 = vector.extract_strided_slice %14 {offsets = [6, 0], sizes = [2, 32], strides = [1, 1]} : vector<16x32xf32> to vector<2x32xf32>
    %cst_28 = arith.constant dense<0.000000e+00> : vector<2x32xf32>
    %78 = tpu.matmul %74, %1, %cst_28 {dimension_numbers = #tpu.dot_dimension_numbers<[1], [0], [0], [1], [0, 0, 1, 1], [], []>} : vector<2x8xf32>, vector<8x32xf32>, vector<2x32xf32> -> vector<2x32xf32>
    %79 = arith.addf %77, %78 : vector<2x32xf32>
    %80 = arith.negf %79 : vector<2x32xf32>
    %81 = math.exp %80 : vector<2x32xf32>
    %cst_29 = arith.constant 1.000000e+00 : f32
    %82 = vector.broadcast %cst_29 : f32 to vector<2x32xf32>
    %83 = arith.addf %82, %81 : vector<2x32xf32>
    %84 = arith.divf %82, %83 : vector<2x32xf32>
    %85 = vector.extract_strided_slice %84 {offsets = [0, 0], sizes = [2, 8], strides = [1, 1]} : vector<2x32xf32> to vector<2x8xf32>
    %86 = vector.extract_strided_slice %84 {offsets = [0, 8], sizes = [2, 8], strides = [1, 1]} : vector<2x32xf32> to vector<2x8xf32>
    %87 = vector.extract_strided_slice %84 {offsets = [0, 24], sizes = [2, 8], strides = [1, 1]} : vector<2x32xf32> to vector<2x8xf32>
    %88 = vector.extract_strided_slice %79 {offsets = [0, 16], sizes = [2, 8], strides = [1, 1]} : vector<2x32xf32> to vector<2x8xf32>
    %89 = math.tanh %88 : vector<2x8xf32>
    %90 = arith.mulf %86, %72 : vector<2x8xf32>
    %91 = arith.mulf %85, %89 : vector<2x8xf32>
    %92 = arith.addf %90, %91 : vector<2x8xf32>
    %93 = math.tanh %92 : vector<2x8xf32>
    %94 = arith.mulf %87, %93 : vector<2x8xf32>
    %cst_30 = arith.constant 0.000000e+00 : f32
    %95 = vector.broadcast %cst_30 : f32 to vector<2x8xf32>
    %96 = arith.maximumf %94, %95 : vector<2x8xf32>
    %97 = vector.extract_strided_slice %14 {offsets = [8, 0], sizes = [2, 32], strides = [1, 1]} : vector<16x32xf32> to vector<2x32xf32>
    %cst_31 = arith.constant dense<0.000000e+00> : vector<2x32xf32>
    %98 = tpu.matmul %94, %1, %cst_31 {dimension_numbers = #tpu.dot_dimension_numbers<[1], [0], [0], [1], [0, 0, 1, 1], [], []>} : vector<2x8xf32>, vector<8x32xf32>, vector<2x32xf32> -> vector<2x32xf32>
    %99 = arith.addf %97, %98 : vector<2x32xf32>
    %100 = arith.negf %99 : vector<2x32xf32>
    %101 = math.exp %100 : vector<2x32xf32>
    %cst_32 = arith.constant 1.000000e+00 : f32
    %102 = vector.broadcast %cst_32 : f32 to vector<2x32xf32>
    %103 = arith.addf %102, %101 : vector<2x32xf32>
    %104 = arith.divf %102, %103 : vector<2x32xf32>
    %105 = vector.extract_strided_slice %104 {offsets = [0, 0], sizes = [2, 8], strides = [1, 1]} : vector<2x32xf32> to vector<2x8xf32>
    %106 = vector.extract_strided_slice %104 {offsets = [0, 8], sizes = [2, 8], strides = [1, 1]} : vector<2x32xf32> to vector<2x8xf32>
    %107 = vector.extract_strided_slice %104 {offsets = [0, 24], sizes = [2, 8], strides = [1, 1]} : vector<2x32xf32> to vector<2x8xf32>
    %108 = vector.extract_strided_slice %99 {offsets = [0, 16], sizes = [2, 8], strides = [1, 1]} : vector<2x32xf32> to vector<2x8xf32>
    %109 = math.tanh %108 : vector<2x8xf32>
    %110 = arith.mulf %106, %92 : vector<2x8xf32>
    %111 = arith.mulf %105, %109 : vector<2x8xf32>
    %112 = arith.addf %110, %111 : vector<2x8xf32>
    %113 = math.tanh %112 : vector<2x8xf32>
    %114 = arith.mulf %107, %113 : vector<2x8xf32>
    %cst_33 = arith.constant 0.000000e+00 : f32
    %115 = vector.broadcast %cst_33 : f32 to vector<2x8xf32>
    %116 = arith.maximumf %114, %115 : vector<2x8xf32>
    %117 = vector.extract_strided_slice %14 {offsets = [10, 0], sizes = [2, 32], strides = [1, 1]} : vector<16x32xf32> to vector<2x32xf32>
    %cst_34 = arith.constant dense<0.000000e+00> : vector<2x32xf32>
    %118 = tpu.matmul %114, %1, %cst_34 {dimension_numbers = #tpu.dot_dimension_numbers<[1], [0], [0], [1], [0, 0, 1, 1], [], []>} : vector<2x8xf32>, vector<8x32xf32>, vector<2x32xf32> -> vector<2x32xf32>
    %119 = arith.addf %117, %118 : vector<2x32xf32>
    %120 = arith.negf %119 : vector<2x32xf32>
    %121 = math.exp %120 : vector<2x32xf32>
    %cst_35 = arith.constant 1.000000e+00 : f32
    %122 = vector.broadcast %cst_35 : f32 to vector<2x32xf32>
    %123 = arith.addf %122, %121 : vector<2x32xf32>
    %124 = arith.divf %122, %123 : vector<2x32xf32>
    %125 = vector.extract_strided_slice %124 {offsets = [0, 0], sizes = [2, 8], strides = [1, 1]} : vector<2x32xf32> to vector<2x8xf32>
    %126 = vector.extract_strided_slice %124 {offsets = [0, 8], sizes = [2, 8], strides = [1, 1]} : vector<2x32xf32> to vector<2x8xf32>
    %127 = vector.extract_strided_slice %124 {offsets = [0, 24], sizes = [2, 8], strides = [1, 1]} : vector<2x32xf32> to vector<2x8xf32>
    %128 = vector.extract_strided_slice %119 {offsets = [0, 16], sizes = [2, 8], strides = [1, 1]} : vector<2x32xf32> to vector<2x8xf32>
    %129 = math.tanh %128 : vector<2x8xf32>
    %130 = arith.mulf %126, %112 : vector<2x8xf32>
    %131 = arith.mulf %125, %129 : vector<2x8xf32>
    %132 = arith.addf %130, %131 : vector<2x8xf32>
    %133 = math.tanh %132 : vector<2x8xf32>
    %134 = arith.mulf %127, %133 : vector<2x8xf32>
    %cst_36 = arith.constant 0.000000e+00 : f32
    %135 = vector.broadcast %cst_36 : f32 to vector<2x8xf32>
    %136 = arith.maximumf %134, %135 : vector<2x8xf32>
    %137 = vector.extract_strided_slice %14 {offsets = [12, 0], sizes = [2, 32], strides = [1, 1]} : vector<16x32xf32> to vector<2x32xf32>
    %cst_37 = arith.constant dense<0.000000e+00> : vector<2x32xf32>
    %138 = tpu.matmul %134, %1, %cst_37 {dimension_numbers = #tpu.dot_dimension_numbers<[1], [0], [0], [1], [0, 0, 1, 1], [], []>} : vector<2x8xf32>, vector<8x32xf32>, vector<2x32xf32> -> vector<2x32xf32>
    %139 = arith.addf %137, %138 : vector<2x32xf32>
    %140 = arith.negf %139 : vector<2x32xf32>
    %141 = math.exp %140 : vector<2x32xf32>
    %cst_38 = arith.constant 1.000000e+00 : f32
    %142 = vector.broadcast %cst_38 : f32 to vector<2x32xf32>
    %143 = arith.addf %142, %141 : vector<2x32xf32>
    %144 = arith.divf %142, %143 : vector<2x32xf32>
    %145 = vector.extract_strided_slice %144 {offsets = [0, 0], sizes = [2, 8], strides = [1, 1]} : vector<2x32xf32> to vector<2x8xf32>
    %146 = vector.extract_strided_slice %144 {offsets = [0, 8], sizes = [2, 8], strides = [1, 1]} : vector<2x32xf32> to vector<2x8xf32>
    %147 = vector.extract_strided_slice %144 {offsets = [0, 24], sizes = [2, 8], strides = [1, 1]} : vector<2x32xf32> to vector<2x8xf32>
    %148 = vector.extract_strided_slice %139 {offsets = [0, 16], sizes = [2, 8], strides = [1, 1]} : vector<2x32xf32> to vector<2x8xf32>
    %149 = math.tanh %148 : vector<2x8xf32>
    %150 = arith.mulf %146, %132 : vector<2x8xf32>
    %151 = arith.mulf %145, %149 : vector<2x8xf32>
    %152 = arith.addf %150, %151 : vector<2x8xf32>
    %153 = math.tanh %152 : vector<2x8xf32>
    %154 = arith.mulf %147, %153 : vector<2x8xf32>
    %cst_39 = arith.constant 0.000000e+00 : f32
    %155 = vector.broadcast %cst_39 : f32 to vector<2x8xf32>
    %156 = arith.maximumf %154, %155 : vector<2x8xf32>
    %157 = vector.extract_strided_slice %14 {offsets = [14, 0], sizes = [2, 32], strides = [1, 1]} : vector<16x32xf32> to vector<2x32xf32>
    %cst_40 = arith.constant dense<0.000000e+00> : vector<2x32xf32>
    %158 = tpu.matmul %154, %1, %cst_40 {dimension_numbers = #tpu.dot_dimension_numbers<[1], [0], [0], [1], [0, 0, 1, 1], [], []>} : vector<2x8xf32>, vector<8x32xf32>, vector<2x32xf32> -> vector<2x32xf32>
    %159 = arith.addf %157, %158 : vector<2x32xf32>
    %160 = arith.negf %159 : vector<2x32xf32>
    %161 = math.exp %160 : vector<2x32xf32>
    %cst_41 = arith.constant 1.000000e+00 : f32
    %162 = vector.broadcast %cst_41 : f32 to vector<2x32xf32>
    %163 = arith.addf %162, %161 : vector<2x32xf32>
    %164 = arith.divf %162, %163 : vector<2x32xf32>
    %165 = vector.extract_strided_slice %164 {offsets = [0, 0], sizes = [2, 8], strides = [1, 1]} : vector<2x32xf32> to vector<2x8xf32>
    %166 = vector.extract_strided_slice %164 {offsets = [0, 8], sizes = [2, 8], strides = [1, 1]} : vector<2x32xf32> to vector<2x8xf32>
    %167 = vector.extract_strided_slice %164 {offsets = [0, 24], sizes = [2, 8], strides = [1, 1]} : vector<2x32xf32> to vector<2x8xf32>
    %168 = vector.extract_strided_slice %159 {offsets = [0, 16], sizes = [2, 8], strides = [1, 1]} : vector<2x32xf32> to vector<2x8xf32>
    %169 = math.tanh %168 : vector<2x8xf32>
    %170 = arith.mulf %166, %152 : vector<2x8xf32>
    %171 = arith.mulf %165, %169 : vector<2x8xf32>
    %172 = arith.addf %170, %171 : vector<2x8xf32>
    %173 = math.tanh %172 : vector<2x8xf32>
    %174 = arith.mulf %167, %173 : vector<2x8xf32>
    %cst_42 = arith.constant 0.000000e+00 : f32
    %175 = vector.broadcast %cst_42 : f32 to vector<2x8xf32>
    %176 = arith.maximumf %174, %175 : vector<2x8xf32>
    %177 = tpu.concatenate %36, %56, %76, %96, %116, %136, %156, %176 in 0 : vector<2x8xf32>, vector<2x8xf32>, vector<2x8xf32>, vector<2x8xf32>, vector<2x8xf32>, vector<2x8xf32>, vector<2x8xf32>, vector<2x8xf32> -> vector<16x8xf32>
    %cst_43 = arith.constant dense<0.000000e+00> : vector<16x64xf32>
    %178 = tpu.matmul %177, %5, %cst_43 {dimension_numbers = #tpu.dot_dimension_numbers<[1], [0], [0], [1], [0, 0, 1, 1], [], []>} : vector<16x8xf32>, vector<8x64xf32>, vector<16x64xf32> -> vector<16x64xf32>
    %179 = vector.broadcast %7 : vector<1x64xf32> to vector<16x64xf32>
    %180 = arith.addf %178, %179 : vector<16x64xf32>
    %cst_44 = arith.constant 0.000000e+00 : f32
    %181 = vector.broadcast %cst_44 : f32 to vector<2x16xf32>
    %cst_45 = arith.constant 0.000000e+00 : f32
    %182 = vector.broadcast %cst_45 : f32 to vector<2x16xf32>
    %183 = vector.extract_strided_slice %180 {offsets = [0, 0], sizes = [2, 64], strides = [1, 1]} : vector<16x64xf32> to vector<2x64xf32>
    %cst_46 = arith.constant dense<0.000000e+00> : vector<2x64xf32>
    %184 = tpu.matmul %181, %6, %cst_46 {dimension_numbers = #tpu.dot_dimension_numbers<[1], [0], [0], [1], [0, 0, 1, 1], [], []>} : vector<2x16xf32>, vector<16x64xf32>, vector<2x64xf32> -> vector<2x64xf32>
    %185 = arith.addf %183, %184 : vector<2x64xf32>
    %186 = arith.negf %185 : vector<2x64xf32>
    %187 = math.exp %186 : vector<2x64xf32>
    %cst_47 = arith.constant 1.000000e+00 : f32
    %188 = vector.broadcast %cst_47 : f32 to vector<2x64xf32>
    %189 = arith.addf %188, %187 : vector<2x64xf32>
    %190 = arith.divf %188, %189 : vector<2x64xf32>
    %191 = vector.extract_strided_slice %190 {offsets = [0, 0], sizes = [2, 16], strides = [1, 1]} : vector<2x64xf32> to vector<2x16xf32>
    %192 = vector.extract_strided_slice %190 {offsets = [0, 16], sizes = [2, 16], strides = [1, 1]} : vector<2x64xf32> to vector<2x16xf32>
    %193 = vector.extract_strided_slice %190 {offsets = [0, 48], sizes = [2, 16], strides = [1, 1]} : vector<2x64xf32> to vector<2x16xf32>
    %194 = vector.extract_strided_slice %185 {offsets = [0, 32], sizes = [2, 16], strides = [1, 1]} : vector<2x64xf32> to vector<2x16xf32>
    %195 = math.tanh %194 : vector<2x16xf32>
    %196 = arith.mulf %192, %182 : vector<2x16xf32>
    %197 = arith.mulf %191, %195 : vector<2x16xf32>
    %198 = arith.addf %196, %197 : vector<2x16xf32>
    %199 = math.tanh %198 : vector<2x16xf32>
    %200 = arith.mulf %193, %199 : vector<2x16xf32>
    %cst_48 = arith.constant 0.000000e+00 : f32
    %201 = vector.broadcast %cst_48 : f32 to vector<2x16xf32>
    %202 = arith.maximumf %200, %201 : vector<2x16xf32>
    %203 = vector.extract_strided_slice %180 {offsets = [2, 0], sizes = [2, 64], strides = [1, 1]} : vector<16x64xf32> to vector<2x64xf32>
    %cst_49 = arith.constant dense<0.000000e+00> : vector<2x64xf32>
    %204 = tpu.matmul %200, %6, %cst_49 {dimension_numbers = #tpu.dot_dimension_numbers<[1], [0], [0], [1], [0, 0, 1, 1], [], []>} : vector<2x16xf32>, vector<16x64xf32>, vector<2x64xf32> -> vector<2x64xf32>
    %205 = arith.addf %203, %204 : vector<2x64xf32>
    %206 = arith.negf %205 : vector<2x64xf32>
    %207 = math.exp %206 : vector<2x64xf32>
    %cst_50 = arith.constant 1.000000e+00 : f32
    %208 = vector.broadcast %cst_50 : f32 to vector<2x64xf32>
    %209 = arith.addf %208, %207 : vector<2x64xf32>
    %210 = arith.divf %208, %209 : vector<2x64xf32>
    %211 = vector.extract_strided_slice %210 {offsets = [0, 0], sizes = [2, 16], strides = [1, 1]} : vector<2x64xf32> to vector<2x16xf32>
    %212 = vector.extract_strided_slice %210 {offsets = [0, 16], sizes = [2, 16], strides = [1, 1]} : vector<2x64xf32> to vector<2x16xf32>
    %213 = vector.extract_strided_slice %210 {offsets = [0, 48], sizes = [2, 16], strides = [1, 1]} : vector<2x64xf32> to vector<2x16xf32>
    %214 = vector.extract_strided_slice %205 {offsets = [0, 32], sizes = [2, 16], strides = [1, 1]} : vector<2x64xf32> to vector<2x16xf32>
    %215 = math.tanh %214 : vector<2x16xf32>
    %216 = arith.mulf %212, %198 : vector<2x16xf32>
    %217 = arith.mulf %211, %215 : vector<2x16xf32>
    %218 = arith.addf %216, %217 : vector<2x16xf32>
    %219 = math.tanh %218 : vector<2x16xf32>
    %220 = arith.mulf %213, %219 : vector<2x16xf32>
    %cst_51 = arith.constant 0.000000e+00 : f32
    %221 = vector.broadcast %cst_51 : f32 to vector<2x16xf32>
    %222 = arith.maximumf %220, %221 : vector<2x16xf32>
    %223 = vector.extract_strided_slice %180 {offsets = [4, 0], sizes = [2, 64], strides = [1, 1]} : vector<16x64xf32> to vector<2x64xf32>
    %cst_52 = arith.constant dense<0.000000e+00> : vector<2x64xf32>
    %224 = tpu.matmul %220, %6, %cst_52 {dimension_numbers = #tpu.dot_dimension_numbers<[1], [0], [0], [1], [0, 0, 1, 1], [], []>} : vector<2x16xf32>, vector<16x64xf32>, vector<2x64xf32> -> vector<2x64xf32>
    %225 = arith.addf %223, %224 : vector<2x64xf32>
    %226 = arith.negf %225 : vector<2x64xf32>
    %227 = math.exp %226 : vector<2x64xf32>
    %cst_53 = arith.constant 1.000000e+00 : f32
    %228 = vector.broadcast %cst_53 : f32 to vector<2x64xf32>
    %229 = arith.addf %228, %227 : vector<2x64xf32>
    %230 = arith.divf %228, %229 : vector<2x64xf32>
    %231 = vector.extract_strided_slice %230 {offsets = [0, 0], sizes = [2, 16], strides = [1, 1]} : vector<2x64xf32> to vector<2x16xf32>
    %232 = vector.extract_strided_slice %230 {offsets = [0, 16], sizes = [2, 16], strides = [1, 1]} : vector<2x64xf32> to vector<2x16xf32>
    %233 = vector.extract_strided_slice %230 {offsets = [0, 48], sizes = [2, 16], strides = [1, 1]} : vector<2x64xf32> to vector<2x16xf32>
    %234 = vector.extract_strided_slice %225 {offsets = [0, 32], sizes = [2, 16], strides = [1, 1]} : vector<2x64xf32> to vector<2x16xf32>
    %235 = math.tanh %234 : vector<2x16xf32>
    %236 = arith.mulf %232, %218 : vector<2x16xf32>
    %237 = arith.mulf %231, %235 : vector<2x16xf32>
    %238 = arith.addf %236, %237 : vector<2x16xf32>
    %239 = math.tanh %238 : vector<2x16xf32>
    %240 = arith.mulf %233, %239 : vector<2x16xf32>
    %cst_54 = arith.constant 0.000000e+00 : f32
    %241 = vector.broadcast %cst_54 : f32 to vector<2x16xf32>
    %242 = arith.maximumf %240, %241 : vector<2x16xf32>
    %243 = vector.extract_strided_slice %180 {offsets = [6, 0], sizes = [2, 64], strides = [1, 1]} : vector<16x64xf32> to vector<2x64xf32>
    %cst_55 = arith.constant dense<0.000000e+00> : vector<2x64xf32>
    %244 = tpu.matmul %240, %6, %cst_55 {dimension_numbers = #tpu.dot_dimension_numbers<[1], [0], [0], [1], [0, 0, 1, 1], [], []>} : vector<2x16xf32>, vector<16x64xf32>, vector<2x64xf32> -> vector<2x64xf32>
    %245 = arith.addf %243, %244 : vector<2x64xf32>
    %246 = arith.negf %245 : vector<2x64xf32>
    %247 = math.exp %246 : vector<2x64xf32>
    %cst_56 = arith.constant 1.000000e+00 : f32
    %248 = vector.broadcast %cst_56 : f32 to vector<2x64xf32>
    %249 = arith.addf %248, %247 : vector<2x64xf32>
    %250 = arith.divf %248, %249 : vector<2x64xf32>
    %251 = vector.extract_strided_slice %250 {offsets = [0, 0], sizes = [2, 16], strides = [1, 1]} : vector<2x64xf32> to vector<2x16xf32>
    %252 = vector.extract_strided_slice %250 {offsets = [0, 16], sizes = [2, 16], strides = [1, 1]} : vector<2x64xf32> to vector<2x16xf32>
    %253 = vector.extract_strided_slice %250 {offsets = [0, 48], sizes = [2, 16], strides = [1, 1]} : vector<2x64xf32> to vector<2x16xf32>
    %254 = vector.extract_strided_slice %245 {offsets = [0, 32], sizes = [2, 16], strides = [1, 1]} : vector<2x64xf32> to vector<2x16xf32>
    %255 = math.tanh %254 : vector<2x16xf32>
    %256 = arith.mulf %252, %238 : vector<2x16xf32>
    %257 = arith.mulf %251, %255 : vector<2x16xf32>
    %258 = arith.addf %256, %257 : vector<2x16xf32>
    %259 = math.tanh %258 : vector<2x16xf32>
    %260 = arith.mulf %253, %259 : vector<2x16xf32>
    %cst_57 = arith.constant 0.000000e+00 : f32
    %261 = vector.broadcast %cst_57 : f32 to vector<2x16xf32>
    %262 = arith.maximumf %260, %261 : vector<2x16xf32>
    %263 = vector.extract_strided_slice %180 {offsets = [8, 0], sizes = [2, 64], strides = [1, 1]} : vector<16x64xf32> to vector<2x64xf32>
    %cst_58 = arith.constant dense<0.000000e+00> : vector<2x64xf32>
    %264 = tpu.matmul %260, %6, %cst_58 {dimension_numbers = #tpu.dot_dimension_numbers<[1], [0], [0], [1], [0, 0, 1, 1], [], []>} : vector<2x16xf32>, vector<16x64xf32>, vector<2x64xf32> -> vector<2x64xf32>
    %265 = arith.addf %263, %264 : vector<2x64xf32>
    %266 = arith.negf %265 : vector<2x64xf32>
    %267 = math.exp %266 : vector<2x64xf32>
    %cst_59 = arith.constant 1.000000e+00 : f32
    %268 = vector.broadcast %cst_59 : f32 to vector<2x64xf32>
    %269 = arith.addf %268, %267 : vector<2x64xf32>
    %270 = arith.divf %268, %269 : vector<2x64xf32>
    %271 = vector.extract_strided_slice %270 {offsets = [0, 0], sizes = [2, 16], strides = [1, 1]} : vector<2x64xf32> to vector<2x16xf32>
    %272 = vector.extract_strided_slice %270 {offsets = [0, 16], sizes = [2, 16], strides = [1, 1]} : vector<2x64xf32> to vector<2x16xf32>
    %273 = vector.extract_strided_slice %270 {offsets = [0, 48], sizes = [2, 16], strides = [1, 1]} : vector<2x64xf32> to vector<2x16xf32>
    %274 = vector.extract_strided_slice %265 {offsets = [0, 32], sizes = [2, 16], strides = [1, 1]} : vector<2x64xf32> to vector<2x16xf32>
    %275 = math.tanh %274 : vector<2x16xf32>
    %276 = arith.mulf %272, %258 : vector<2x16xf32>
    %277 = arith.mulf %271, %275 : vector<2x16xf32>
    %278 = arith.addf %276, %277 : vector<2x16xf32>
    %279 = math.tanh %278 : vector<2x16xf32>
    %280 = arith.mulf %273, %279 : vector<2x16xf32>
    %cst_60 = arith.constant 0.000000e+00 : f32
    %281 = vector.broadcast %cst_60 : f32 to vector<2x16xf32>
    %282 = arith.maximumf %280, %281 : vector<2x16xf32>
    %283 = vector.extract_strided_slice %180 {offsets = [10, 0], sizes = [2, 64], strides = [1, 1]} : vector<16x64xf32> to vector<2x64xf32>
    %cst_61 = arith.constant dense<0.000000e+00> : vector<2x64xf32>
    %284 = tpu.matmul %280, %6, %cst_61 {dimension_numbers = #tpu.dot_dimension_numbers<[1], [0], [0], [1], [0, 0, 1, 1], [], []>} : vector<2x16xf32>, vector<16x64xf32>, vector<2x64xf32> -> vector<2x64xf32>
    %285 = arith.addf %283, %284 : vector<2x64xf32>
    %286 = arith.negf %285 : vector<2x64xf32>
    %287 = math.exp %286 : vector<2x64xf32>
    %cst_62 = arith.constant 1.000000e+00 : f32
    %288 = vector.broadcast %cst_62 : f32 to vector<2x64xf32>
    %289 = arith.addf %288, %287 : vector<2x64xf32>
    %290 = arith.divf %288, %289 : vector<2x64xf32>
    %291 = vector.extract_strided_slice %290 {offsets = [0, 0], sizes = [2, 16], strides = [1, 1]} : vector<2x64xf32> to vector<2x16xf32>
    %292 = vector.extract_strided_slice %290 {offsets = [0, 16], sizes = [2, 16], strides = [1, 1]} : vector<2x64xf32> to vector<2x16xf32>
    %293 = vector.extract_strided_slice %290 {offsets = [0, 48], sizes = [2, 16], strides = [1, 1]} : vector<2x64xf32> to vector<2x16xf32>
    %294 = vector.extract_strided_slice %285 {offsets = [0, 32], sizes = [2, 16], strides = [1, 1]} : vector<2x64xf32> to vector<2x16xf32>
    %295 = math.tanh %294 : vector<2x16xf32>
    %296 = arith.mulf %292, %278 : vector<2x16xf32>
    %297 = arith.mulf %291, %295 : vector<2x16xf32>
    %298 = arith.addf %296, %297 : vector<2x16xf32>
    %299 = math.tanh %298 : vector<2x16xf32>
    %300 = arith.mulf %293, %299 : vector<2x16xf32>
    %cst_63 = arith.constant 0.000000e+00 : f32
    %301 = vector.broadcast %cst_63 : f32 to vector<2x16xf32>
    %302 = arith.maximumf %300, %301 : vector<2x16xf32>
    %303 = vector.extract_strided_slice %180 {offsets = [12, 0], sizes = [2, 64], strides = [1, 1]} : vector<16x64xf32> to vector<2x64xf32>
    %cst_64 = arith.constant dense<0.000000e+00> : vector<2x64xf32>
    %304 = tpu.matmul %300, %6, %cst_64 {dimension_numbers = #tpu.dot_dimension_numbers<[1], [0], [0], [1], [0, 0, 1, 1], [], []>} : vector<2x16xf32>, vector<16x64xf32>, vector<2x64xf32> -> vector<2x64xf32>
    %305 = arith.addf %303, %304 : vector<2x64xf32>
    %306 = arith.negf %305 : vector<2x64xf32>
    %307 = math.exp %306 : vector<2x64xf32>
    %cst_65 = arith.constant 1.000000e+00 : f32
    %308 = vector.broadcast %cst_65 : f32 to vector<2x64xf32>
    %309 = arith.addf %308, %307 : vector<2x64xf32>
    %310 = arith.divf %308, %309 : vector<2x64xf32>
    %311 = vector.extract_strided_slice %310 {offsets = [0, 0], sizes = [2, 16], strides = [1, 1]} : vector<2x64xf32> to vector<2x16xf32>
    %312 = vector.extract_strided_slice %310 {offsets = [0, 16], sizes = [2, 16], strides = [1, 1]} : vector<2x64xf32> to vector<2x16xf32>
    %313 = vector.extract_strided_slice %310 {offsets = [0, 48], sizes = [2, 16], strides = [1, 1]} : vector<2x64xf32> to vector<2x16xf32>
    %314 = vector.extract_strided_slice %305 {offsets = [0, 32], sizes = [2, 16], strides = [1, 1]} : vector<2x64xf32> to vector<2x16xf32>
    %315 = math.tanh %314 : vector<2x16xf32>
    %316 = arith.mulf %312, %298 : vector<2x16xf32>
    %317 = arith.mulf %311, %315 : vector<2x16xf32>
    %318 = arith.addf %316, %317 : vector<2x16xf32>
    %319 = math.tanh %318 : vector<2x16xf32>
    %320 = arith.mulf %313, %319 : vector<2x16xf32>
    %cst_66 = arith.constant 0.000000e+00 : f32
    %321 = vector.broadcast %cst_66 : f32 to vector<2x16xf32>
    %322 = arith.maximumf %320, %321 : vector<2x16xf32>
    %323 = vector.extract_strided_slice %180 {offsets = [14, 0], sizes = [2, 64], strides = [1, 1]} : vector<16x64xf32> to vector<2x64xf32>
    %cst_67 = arith.constant dense<0.000000e+00> : vector<2x64xf32>
    %324 = tpu.matmul %320, %6, %cst_67 {dimension_numbers = #tpu.dot_dimension_numbers<[1], [0], [0], [1], [0, 0, 1, 1], [], []>} : vector<2x16xf32>, vector<16x64xf32>, vector<2x64xf32> -> vector<2x64xf32>
    %325 = arith.addf %323, %324 : vector<2x64xf32>
    %326 = arith.negf %325 : vector<2x64xf32>
    %327 = math.exp %326 : vector<2x64xf32>
    %cst_68 = arith.constant 1.000000e+00 : f32
    %328 = vector.broadcast %cst_68 : f32 to vector<2x64xf32>
    %329 = arith.addf %328, %327 : vector<2x64xf32>
    %330 = arith.divf %328, %329 : vector<2x64xf32>
    %331 = vector.extract_strided_slice %330 {offsets = [0, 0], sizes = [2, 16], strides = [1, 1]} : vector<2x64xf32> to vector<2x16xf32>
    %332 = vector.extract_strided_slice %330 {offsets = [0, 16], sizes = [2, 16], strides = [1, 1]} : vector<2x64xf32> to vector<2x16xf32>
    %333 = vector.extract_strided_slice %330 {offsets = [0, 48], sizes = [2, 16], strides = [1, 1]} : vector<2x64xf32> to vector<2x16xf32>
    %334 = vector.extract_strided_slice %325 {offsets = [0, 32], sizes = [2, 16], strides = [1, 1]} : vector<2x64xf32> to vector<2x16xf32>
    %335 = math.tanh %334 : vector<2x16xf32>
    %336 = arith.mulf %332, %318 : vector<2x16xf32>
    %337 = arith.mulf %331, %335 : vector<2x16xf32>
    %338 = arith.addf %336, %337 : vector<2x16xf32>
    %339 = math.tanh %338 : vector<2x16xf32>
    %340 = arith.mulf %333, %339 : vector<2x16xf32>
    %cst_69 = arith.constant 0.000000e+00 : f32
    %341 = vector.broadcast %cst_69 : f32 to vector<2x16xf32>
    %342 = arith.maximumf %340, %341 : vector<2x16xf32>
    %343 = tpu.concatenate %202, %222, %242, %262, %282, %302, %322, %342 in 0 : vector<2x16xf32>, vector<2x16xf32>, vector<2x16xf32>, vector<2x16xf32>, vector<2x16xf32>, vector<2x16xf32>, vector<2x16xf32>, vector<2x16xf32> -> vector<16x16xf32>
    %cst_70 = arith.constant dense<0.000000e+00> : vector<16x128xf32>
    %344 = tpu.matmul %343, %8, %cst_70 {dimension_numbers = #tpu.dot_dimension_numbers<[1], [0], [0], [1], [0, 0, 1, 1], [], []>} : vector<16x16xf32>, vector<16x128xf32>, vector<16x128xf32> -> vector<16x128xf32>
    %345 = vector.broadcast %10 : vector<1x128xf32> to vector<16x128xf32>
    %346 = arith.addf %344, %345 : vector<16x128xf32>
    %cst_71 = arith.constant 0.000000e+00 : f32
    %347 = vector.broadcast %cst_71 : f32 to vector<2x32xf32>
    %cst_72 = arith.constant 0.000000e+00 : f32
    %348 = vector.broadcast %cst_72 : f32 to vector<2x32xf32>
    %349 = vector.extract_strided_slice %346 {offsets = [0, 0], sizes = [2, 128], strides = [1, 1]} : vector<16x128xf32> to vector<2x128xf32>
    %cst_73 = arith.constant dense<0.000000e+00> : vector<2x128xf32>
    %350 = tpu.matmul %347, %9, %cst_73 {dimension_numbers = #tpu.dot_dimension_numbers<[1], [0], [0], [1], [0, 0, 1, 1], [], []>} : vector<2x32xf32>, vector<32x128xf32>, vector<2x128xf32> -> vector<2x128xf32>
    %351 = arith.addf %349, %350 : vector<2x128xf32>
    %352 = arith.negf %351 : vector<2x128xf32>
    %353 = math.exp %352 : vector<2x128xf32>
    %cst_74 = arith.constant 1.000000e+00 : f32
    %354 = vector.broadcast %cst_74 : f32 to vector<2x128xf32>
    %355 = arith.addf %354, %353 : vector<2x128xf32>
    %356 = arith.divf %354, %355 : vector<2x128xf32>
    %357 = vector.extract_strided_slice %356 {offsets = [0, 0], sizes = [2, 32], strides = [1, 1]} : vector<2x128xf32> to vector<2x32xf32>
    %358 = vector.extract_strided_slice %356 {offsets = [0, 32], sizes = [2, 32], strides = [1, 1]} : vector<2x128xf32> to vector<2x32xf32>
    %359 = vector.extract_strided_slice %356 {offsets = [0, 96], sizes = [2, 32], strides = [1, 1]} : vector<2x128xf32> to vector<2x32xf32>
    %360 = vector.extract_strided_slice %351 {offsets = [0, 64], sizes = [2, 32], strides = [1, 1]} : vector<2x128xf32> to vector<2x32xf32>
    %361 = math.tanh %360 : vector<2x32xf32>
    %362 = arith.mulf %358, %348 : vector<2x32xf32>
    %363 = arith.mulf %357, %361 : vector<2x32xf32>
    %364 = arith.addf %362, %363 : vector<2x32xf32>
    %365 = math.tanh %364 : vector<2x32xf32>
    %366 = arith.mulf %359, %365 : vector<2x32xf32>
    %cst_75 = arith.constant 0.000000e+00 : f32
    %367 = vector.broadcast %cst_75 : f32 to vector<2x32xf32>
    %368 = arith.maximumf %366, %367 : vector<2x32xf32>
    %369 = vector.extract_strided_slice %346 {offsets = [2, 0], sizes = [2, 128], strides = [1, 1]} : vector<16x128xf32> to vector<2x128xf32>
    %cst_76 = arith.constant dense<0.000000e+00> : vector<2x128xf32>
    %370 = tpu.matmul %366, %9, %cst_76 {dimension_numbers = #tpu.dot_dimension_numbers<[1], [0], [0], [1], [0, 0, 1, 1], [], []>} : vector<2x32xf32>, vector<32x128xf32>, vector<2x128xf32> -> vector<2x128xf32>
    %371 = arith.addf %369, %370 : vector<2x128xf32>
    %372 = arith.negf %371 : vector<2x128xf32>
    %373 = math.exp %372 : vector<2x128xf32>
    %cst_77 = arith.constant 1.000000e+00 : f32
    %374 = vector.broadcast %cst_77 : f32 to vector<2x128xf32>
    %375 = arith.addf %374, %373 : vector<2x128xf32>
    %376 = arith.divf %374, %375 : vector<2x128xf32>
    %377 = vector.extract_strided_slice %376 {offsets = [0, 0], sizes = [2, 32], strides = [1, 1]} : vector<2x128xf32> to vector<2x32xf32>
    %378 = vector.extract_strided_slice %376 {offsets = [0, 32], sizes = [2, 32], strides = [1, 1]} : vector<2x128xf32> to vector<2x32xf32>
    %379 = vector.extract_strided_slice %376 {offsets = [0, 96], sizes = [2, 32], strides = [1, 1]} : vector<2x128xf32> to vector<2x32xf32>
    %380 = vector.extract_strided_slice %371 {offsets = [0, 64], sizes = [2, 32], strides = [1, 1]} : vector<2x128xf32> to vector<2x32xf32>
    %381 = math.tanh %380 : vector<2x32xf32>
    %382 = arith.mulf %378, %364 : vector<2x32xf32>
    %383 = arith.mulf %377, %381 : vector<2x32xf32>
    %384 = arith.addf %382, %383 : vector<2x32xf32>
    %385 = math.tanh %384 : vector<2x32xf32>
    %386 = arith.mulf %379, %385 : vector<2x32xf32>
    %cst_78 = arith.constant 0.000000e+00 : f32
    %387 = vector.broadcast %cst_78 : f32 to vector<2x32xf32>
    %388 = arith.maximumf %386, %387 : vector<2x32xf32>
    %389 = vector.extract_strided_slice %346 {offsets = [4, 0], sizes = [2, 128], strides = [1, 1]} : vector<16x128xf32> to vector<2x128xf32>
    %cst_79 = arith.constant dense<0.000000e+00> : vector<2x128xf32>
    %390 = tpu.matmul %386, %9, %cst_79 {dimension_numbers = #tpu.dot_dimension_numbers<[1], [0], [0], [1], [0, 0, 1, 1], [], []>} : vector<2x32xf32>, vector<32x128xf32>, vector<2x128xf32> -> vector<2x128xf32>
    %391 = arith.addf %389, %390 : vector<2x128xf32>
    %392 = arith.negf %391 : vector<2x128xf32>
    %393 = math.exp %392 : vector<2x128xf32>
    %cst_80 = arith.constant 1.000000e+00 : f32
    %394 = vector.broadcast %cst_80 : f32 to vector<2x128xf32>
    %395 = arith.addf %394, %393 : vector<2x128xf32>
    %396 = arith.divf %394, %395 : vector<2x128xf32>
    %397 = vector.extract_strided_slice %396 {offsets = [0, 0], sizes = [2, 32], strides = [1, 1]} : vector<2x128xf32> to vector<2x32xf32>
    %398 = vector.extract_strided_slice %396 {offsets = [0, 32], sizes = [2, 32], strides = [1, 1]} : vector<2x128xf32> to vector<2x32xf32>
    %399 = vector.extract_strided_slice %396 {offsets = [0, 96], sizes = [2, 32], strides = [1, 1]} : vector<2x128xf32> to vector<2x32xf32>
    %400 = vector.extract_strided_slice %391 {offsets = [0, 64], sizes = [2, 32], strides = [1, 1]} : vector<2x128xf32> to vector<2x32xf32>
    %401 = math.tanh %400 : vector<2x32xf32>
    %402 = arith.mulf %398, %384 : vector<2x32xf32>
    %403 = arith.mulf %397, %401 : vector<2x32xf32>
    %404 = arith.addf %402, %403 : vector<2x32xf32>
    %405 = math.tanh %404 : vector<2x32xf32>
    %406 = arith.mulf %399, %405 : vector<2x32xf32>
    %cst_81 = arith.constant 0.000000e+00 : f32
    %407 = vector.broadcast %cst_81 : f32 to vector<2x32xf32>
    %408 = arith.maximumf %406, %407 : vector<2x32xf32>
    %409 = vector.extract_strided_slice %346 {offsets = [6, 0], sizes = [2, 128], strides = [1, 1]} : vector<16x128xf32> to vector<2x128xf32>
    %cst_82 = arith.constant dense<0.000000e+00> : vector<2x128xf32>
    %410 = tpu.matmul %406, %9, %cst_82 {dimension_numbers = #tpu.dot_dimension_numbers<[1], [0], [0], [1], [0, 0, 1, 1], [], []>} : vector<2x32xf32>, vector<32x128xf32>, vector<2x128xf32> -> vector<2x128xf32>
    %411 = arith.addf %409, %410 : vector<2x128xf32>
    %412 = arith.negf %411 : vector<2x128xf32>
    %413 = math.exp %412 : vector<2x128xf32>
    %cst_83 = arith.constant 1.000000e+00 : f32
    %414 = vector.broadcast %cst_83 : f32 to vector<2x128xf32>
    %415 = arith.addf %414, %413 : vector<2x128xf32>
    %416 = arith.divf %414, %415 : vector<2x128xf32>
    %417 = vector.extract_strided_slice %416 {offsets = [0, 0], sizes = [2, 32], strides = [1, 1]} : vector<2x128xf32> to vector<2x32xf32>
    %418 = vector.extract_strided_slice %416 {offsets = [0, 32], sizes = [2, 32], strides = [1, 1]} : vector<2x128xf32> to vector<2x32xf32>
    %419 = vector.extract_strided_slice %416 {offsets = [0, 96], sizes = [2, 32], strides = [1, 1]} : vector<2x128xf32> to vector<2x32xf32>
    %420 = vector.extract_strided_slice %411 {offsets = [0, 64], sizes = [2, 32], strides = [1, 1]} : vector<2x128xf32> to vector<2x32xf32>
    %421 = math.tanh %420 : vector<2x32xf32>
    %422 = arith.mulf %418, %404 : vector<2x32xf32>
    %423 = arith.mulf %417, %421 : vector<2x32xf32>
    %424 = arith.addf %422, %423 : vector<2x32xf32>
    %425 = math.tanh %424 : vector<2x32xf32>
    %426 = arith.mulf %419, %425 : vector<2x32xf32>
    %cst_84 = arith.constant 0.000000e+00 : f32
    %427 = vector.broadcast %cst_84 : f32 to vector<2x32xf32>
    %428 = arith.maximumf %426, %427 : vector<2x32xf32>
    %429 = vector.extract_strided_slice %346 {offsets = [8, 0], sizes = [2, 128], strides = [1, 1]} : vector<16x128xf32> to vector<2x128xf32>
    %cst_85 = arith.constant dense<0.000000e+00> : vector<2x128xf32>
    %430 = tpu.matmul %426, %9, %cst_85 {dimension_numbers = #tpu.dot_dimension_numbers<[1], [0], [0], [1], [0, 0, 1, 1], [], []>} : vector<2x32xf32>, vector<32x128xf32>, vector<2x128xf32> -> vector<2x128xf32>
    %431 = arith.addf %429, %430 : vector<2x128xf32>
    %432 = arith.negf %431 : vector<2x128xf32>
    %433 = math.exp %432 : vector<2x128xf32>
    %cst_86 = arith.constant 1.000000e+00 : f32
    %434 = vector.broadcast %cst_86 : f32 to vector<2x128xf32>
    %435 = arith.addf %434, %433 : vector<2x128xf32>
    %436 = arith.divf %434, %435 : vector<2x128xf32>
    %437 = vector.extract_strided_slice %436 {offsets = [0, 0], sizes = [2, 32], strides = [1, 1]} : vector<2x128xf32> to vector<2x32xf32>
    %438 = vector.extract_strided_slice %436 {offsets = [0, 32], sizes = [2, 32], strides = [1, 1]} : vector<2x128xf32> to vector<2x32xf32>
    %439 = vector.extract_strided_slice %436 {offsets = [0, 96], sizes = [2, 32], strides = [1, 1]} : vector<2x128xf32> to vector<2x32xf32>
    %440 = vector.extract_strided_slice %431 {offsets = [0, 64], sizes = [2, 32], strides = [1, 1]} : vector<2x128xf32> to vector<2x32xf32>
    %441 = math.tanh %440 : vector<2x32xf32>
    %442 = arith.mulf %438, %424 : vector<2x32xf32>
    %443 = arith.mulf %437, %441 : vector<2x32xf32>
    %444 = arith.addf %442, %443 : vector<2x32xf32>
    %445 = math.tanh %444 : vector<2x32xf32>
    %446 = arith.mulf %439, %445 : vector<2x32xf32>
    %cst_87 = arith.constant 0.000000e+00 : f32
    %447 = vector.broadcast %cst_87 : f32 to vector<2x32xf32>
    %448 = arith.maximumf %446, %447 : vector<2x32xf32>
    %449 = vector.extract_strided_slice %346 {offsets = [10, 0], sizes = [2, 128], strides = [1, 1]} : vector<16x128xf32> to vector<2x128xf32>
    %cst_88 = arith.constant dense<0.000000e+00> : vector<2x128xf32>
    %450 = tpu.matmul %446, %9, %cst_88 {dimension_numbers = #tpu.dot_dimension_numbers<[1], [0], [0], [1], [0, 0, 1, 1], [], []>} : vector<2x32xf32>, vector<32x128xf32>, vector<2x128xf32> -> vector<2x128xf32>
    %451 = arith.addf %449, %450 : vector<2x128xf32>
    %452 = arith.negf %451 : vector<2x128xf32>
    %453 = math.exp %452 : vector<2x128xf32>
    %cst_89 = arith.constant 1.000000e+00 : f32
    %454 = vector.broadcast %cst_89 : f32 to vector<2x128xf32>
    %455 = arith.addf %454, %453 : vector<2x128xf32>
    %456 = arith.divf %454, %455 : vector<2x128xf32>
    %457 = vector.extract_strided_slice %456 {offsets = [0, 0], sizes = [2, 32], strides = [1, 1]} : vector<2x128xf32> to vector<2x32xf32>
    %458 = vector.extract_strided_slice %456 {offsets = [0, 32], sizes = [2, 32], strides = [1, 1]} : vector<2x128xf32> to vector<2x32xf32>
    %459 = vector.extract_strided_slice %456 {offsets = [0, 96], sizes = [2, 32], strides = [1, 1]} : vector<2x128xf32> to vector<2x32xf32>
    %460 = vector.extract_strided_slice %451 {offsets = [0, 64], sizes = [2, 32], strides = [1, 1]} : vector<2x128xf32> to vector<2x32xf32>
    %461 = math.tanh %460 : vector<2x32xf32>
    %462 = arith.mulf %458, %444 : vector<2x32xf32>
    %463 = arith.mulf %457, %461 : vector<2x32xf32>
    %464 = arith.addf %462, %463 : vector<2x32xf32>
    %465 = math.tanh %464 : vector<2x32xf32>
    %466 = arith.mulf %459, %465 : vector<2x32xf32>
    %cst_90 = arith.constant 0.000000e+00 : f32
    %467 = vector.broadcast %cst_90 : f32 to vector<2x32xf32>
    %468 = arith.maximumf %466, %467 : vector<2x32xf32>
    %469 = vector.extract_strided_slice %346 {offsets = [12, 0], sizes = [2, 128], strides = [1, 1]} : vector<16x128xf32> to vector<2x128xf32>
    %cst_91 = arith.constant dense<0.000000e+00> : vector<2x128xf32>
    %470 = tpu.matmul %466, %9, %cst_91 {dimension_numbers = #tpu.dot_dimension_numbers<[1], [0], [0], [1], [0, 0, 1, 1], [], []>} : vector<2x32xf32>, vector<32x128xf32>, vector<2x128xf32> -> vector<2x128xf32>
    %471 = arith.addf %469, %470 : vector<2x128xf32>
    %472 = arith.negf %471 : vector<2x128xf32>
    %473 = math.exp %472 : vector<2x128xf32>
    %cst_92 = arith.constant 1.000000e+00 : f32
    %474 = vector.broadcast %cst_92 : f32 to vector<2x128xf32>
    %475 = arith.addf %474, %473 : vector<2x128xf32>
    %476 = arith.divf %474, %475 : vector<2x128xf32>
    %477 = vector.extract_strided_slice %476 {offsets = [0, 0], sizes = [2, 32], strides = [1, 1]} : vector<2x128xf32> to vector<2x32xf32>
    %478 = vector.extract_strided_slice %476 {offsets = [0, 32], sizes = [2, 32], strides = [1, 1]} : vector<2x128xf32> to vector<2x32xf32>
    %479 = vector.extract_strided_slice %476 {offsets = [0, 96], sizes = [2, 32], strides = [1, 1]} : vector<2x128xf32> to vector<2x32xf32>
    %480 = vector.extract_strided_slice %471 {offsets = [0, 64], sizes = [2, 32], strides = [1, 1]} : vector<2x128xf32> to vector<2x32xf32>
    %481 = math.tanh %480 : vector<2x32xf32>
    %482 = arith.mulf %478, %464 : vector<2x32xf32>
    %483 = arith.mulf %477, %481 : vector<2x32xf32>
    %484 = arith.addf %482, %483 : vector<2x32xf32>
    %485 = math.tanh %484 : vector<2x32xf32>
    %486 = arith.mulf %479, %485 : vector<2x32xf32>
    %cst_93 = arith.constant 0.000000e+00 : f32
    %487 = vector.broadcast %cst_93 : f32 to vector<2x32xf32>
    %488 = arith.maximumf %486, %487 : vector<2x32xf32>
    %489 = vector.extract_strided_slice %346 {offsets = [14, 0], sizes = [2, 128], strides = [1, 1]} : vector<16x128xf32> to vector<2x128xf32>
    %cst_94 = arith.constant dense<0.000000e+00> : vector<2x128xf32>
    %490 = tpu.matmul %486, %9, %cst_94 {dimension_numbers = #tpu.dot_dimension_numbers<[1], [0], [0], [1], [0, 0, 1, 1], [], []>} : vector<2x32xf32>, vector<32x128xf32>, vector<2x128xf32> -> vector<2x128xf32>
    %491 = arith.addf %489, %490 : vector<2x128xf32>
    %492 = arith.negf %491 : vector<2x128xf32>
    %493 = math.exp %492 : vector<2x128xf32>
    %cst_95 = arith.constant 1.000000e+00 : f32
    %494 = vector.broadcast %cst_95 : f32 to vector<2x128xf32>
    %495 = arith.addf %494, %493 : vector<2x128xf32>
    %496 = arith.divf %494, %495 : vector<2x128xf32>
    %497 = vector.extract_strided_slice %496 {offsets = [0, 0], sizes = [2, 32], strides = [1, 1]} : vector<2x128xf32> to vector<2x32xf32>
    %498 = vector.extract_strided_slice %496 {offsets = [0, 32], sizes = [2, 32], strides = [1, 1]} : vector<2x128xf32> to vector<2x32xf32>
    %499 = vector.extract_strided_slice %496 {offsets = [0, 96], sizes = [2, 32], strides = [1, 1]} : vector<2x128xf32> to vector<2x32xf32>
    %500 = vector.extract_strided_slice %491 {offsets = [0, 64], sizes = [2, 32], strides = [1, 1]} : vector<2x128xf32> to vector<2x32xf32>
    %501 = math.tanh %500 : vector<2x32xf32>
    %502 = arith.mulf %498, %484 : vector<2x32xf32>
    %503 = arith.mulf %497, %501 : vector<2x32xf32>
    %504 = arith.addf %502, %503 : vector<2x32xf32>
    %505 = math.tanh %504 : vector<2x32xf32>
    %506 = arith.mulf %499, %505 : vector<2x32xf32>
    %cst_96 = arith.constant 0.000000e+00 : f32
    %507 = vector.broadcast %cst_96 : f32 to vector<2x32xf32>
    %508 = arith.maximumf %506, %507 : vector<2x32xf32>
    %509 = tpu.concatenate %368, %388, %408, %428, %448, %468, %488, %508 in 0 : vector<2x32xf32>, vector<2x32xf32>, vector<2x32xf32>, vector<2x32xf32>, vector<2x32xf32>, vector<2x32xf32>, vector<2x32xf32>, vector<2x32xf32> -> vector<16x32xf32>
    %cst_97 = arith.constant dense<0.000000e+00> : vector<16x32xf32>
    %510 = tpu.matmul %509, %3, %cst_97 {dimension_numbers = #tpu.dot_dimension_numbers<[1], [0], [0], [1], [0, 0, 1, 1], [], []>} : vector<16x32xf32>, vector<32x32xf32>, vector<16x32xf32> -> vector<16x32xf32>
    %511 = vector.broadcast %4 : vector<1x32xf32> to vector<16x32xf32>
    %512 = arith.addf %510, %511 : vector<16x32xf32>
    %513 = arith.mulf %509, %512 : vector<16x32xf32>
    %c0_98 = arith.constant 0 : index
    %c0_99 = arith.constant 0 : index
    %514 = vector.load %arg4[%c0_98, %c0_99] : memref<16x32xf32, #tpu.memory_space<vmem>>, vector<16x32xf32>
    tpu.vector_store %arg4[%c0_98, %c0_99], %513 {strides = array<i32>} : memref<16x32xf32, #tpu.memory_space<vmem>>, vector<16x32xf32>,
    return
  }
}

</mosaic_0001>

<bundles_post_ra>
// kernel: unet_forward_pallas.1
= control target key start
LH: loop header
LB: loop body
LE: loop exit
PB: predicated region body
PF: predicated region fallthrough
CT: control target
= control target key end

     0   :  { %vm44_vm0 = vcmask 130048   ;;  %v3685_v4 = vmov 0.0   ;;  %s4123_s0 = inlined_call_operand.vmem [shape: f32[16,16], index: 0, kind: input, shape index: {}]   ;;  %s4124_s1 = inlined_call_operand.vmem [shape: f32[72,32], index: 1, kind: input, shape index: {}]   ;;  %s4125_s2 = inlined_call_operand.vmem [shape: f32[32,64], index: 2, kind: input, shape index: {}]   ;;  %s4126_s3 = inlined_call_operand.vmem [shape: f32[56,128], index: 3, kind: input, shape index: {}]   ;;  %s4127_s4 = inlined_call_operand.hbm [shape: f32[16,32], index: 4, kind: output, shape index: {}]  }
   0x1   :  { %v18_v0 = vld [vmem:[%s4124_s1] sm:$0xff]  ;;  %v19_v1 = vld [vmem:[%s4124_s1 + $0x8] sm:$0xff]  ;;  %3161 = vmatprep.subr.mxu1 %v3685_v4  ;;  %v3737_v5 = vld [vmem:[%s4124_s1 + $0x10] sm:$0xff] }
   0x2   :  { %v38_v2 = vld [vmem:[%s4123_s0] sm:$0xff]  ;;  %v3368_v3 = vpack.c.bf16 %v19_v1, %v18_v0 }
   0x3   :  { %3158 = vmatprep.mubr.msk.f32.mxu0 %vm44_vm0, %v38_v2 }
   0x4   :  { %9 = vsyncpa [#allocation3], 0  ;;  %3162 = vmatpush3.msra.mxu1 %v3737_v5  ;;  %vm3686_vm1 = vmmov 0   ;;  %3369 = vmatprep.subr.bf16.mxu0 %v3368_v3  ;;  %v39_v6 = vld [vmem:[%s4123_s0 + $0x8] sm:$0xff]  ;;  %v3000_v9 = vld [vmem:[%s4124_s1 + $0x18] ss:$0 sm:$0xff] }
   0x5   :  { %3163 = vmatprep.mubr.msk.f32.mxu1 %vm3686_vm1, %v3685_v4  ;;  %3371 = vmatpush3.bf16.msra.mxu0 %v3368_v3  ;;  %s3687_s26 = smov 112   ;;  %s3688_s27 = smov 8   ;;  %vm126_vm2 = vcmask 64512   ;;  %vm977_vm3 = vcmask 1041408   ;;  %vm979_vm4 = vcmask 1043456   ;;  %vm981_vm5 = vcmask 1045504  }
   0x6   :  { %3164 = vmatmul.mubr.f32.vlgmr.msra.gmra.mrb[0].mxu1 %v3685_v4  ;;  %3166 = vmatprep.subr.mxu1 %v3685_v4  ;;  %s3689_s28 = smov 16   ;;  %s3690_s29 = smov 104   ;;  %vm2019_vm6 = vcmask 261120  }
   0x7   :  { %3167 = vmatpush3.msra.mxu1 %v3737_v5  ;;  %3168 = vmatprep.mubr.msk.f32.mxu1 %vm3686_vm1, %v3685_v4  ;;  %s3692_s12 = smov 96   ;;  %s3694_s13 = smov 80  }
   0x8   :  { %3171 = vmatprep.subr.mxu1 %v3685_v4  ;;  %3181 = vmatprep.subr.mxu0 %v3685_v4 }
   0x9   :  { %3159 = vmatmul.mubr.msk.f32.vlgmr.msra.gmra.mrb[0].mxu0 %vm44_vm0, %v39_v6 }
   0xa   :  { %3182 = vmatpush3.msra.mxu0 %v3737_v5  ;;  %3183 = vmatprep.mubr.msk.f32.mxu0 %vm3686_vm1, %v3685_v4 }
   0xb   :  { %3191 = vmatprep.subr.mxu0 %v3685_v4 }
  0xd9   :  { %v196_v7 = vpop.f32.mrb[0].mxu1 }
  0xda   :  { %v3165_v8 = vpop.f32.mrb[1].mxu1 }
  0xdc   :  { %v3160_v10 = vpop.f32.mrb[0].mxu0 }
  0xdd   :  { %v3760_v11 = vadd.f32 %v3160_v10, %v3000_v9  ;;  %v117_v12 = vpop.f32.mrb[1].mxu0 }
  0xde   :  { %v3762_v13 = vadd.f32 %v3000_v9, %v117_v12 }
  0xe0   :  { %v200_v14 = vadd.f32 %v196_v7, %v3762_v13 }
  0xe2   :  { %3469 = vtanh.f32 %v200_v14  ;;  %v3003_v16 = vmul.f32 -1.442695, %v200_v14 }
  0xe4   :  { %3471 = vpow2.f32 %v3003_v16 }
  0xec   :  { %v3470_v15 = vpop.eup %3469 }
  0xed   :  { %210 = vrot.lane.b32.xlu0 %v3470_v15, %s3687_s26 }
  0xee   :  { %v3472_v17 = vpop.eup %3471 }
  0xef   :  { %v204_v18 = vadd.f32 1.0, %v3472_v17 }
  0xf1   :  { %3473 = vrcp.f32 %v204_v18 }
  0xfb   :  { %v3474_v19 = vpop.eup %3473 }
  0xfc   :  { %v208_v22 = vmul.f32 0.0, %v3474_v19 }
 0x15f   :  { %v211_v20 = vpop.permute.xlu0 %210 }
 0x160   :  { %v213_v21 = vmul.f32 %v3474_v19, %v211_v20 }
 0x162   :  { %215 = vrot.lane.b32.xlu0 %v213_v21, %s3688_s27 }
 0x1d4   :  { %v216_v23 = vpop.permute.xlu0 %215 }
 0x1d5   :  { %v218_v24 = vadd.f32 %v216_v23, %v208_v22 }
 0x1d7   :  { %3475 = vtanh.f32 %v218_v24  ;;  %v313_v40 = vrot.slane %v218_v24, 6 }
 0x1e1   :  { %v3476_v25 = vpop.eup %3475 }
 0x1e2   :  { %221 = vrot.lane.b32.xlu1 %v3476_v25, %s3689_s28 }
 0x254   :  { %v222_v26 = vpop.permute.xlu1 %221 }
 0x255   :  { %v224_v27 = vmul.f32 %v3474_v19, %v222_v26 }
 0x257   :  { %227 = vrot.lane.b32.xlu1 %v224_v27, %s3690_s29  ;;  %v225_v47 = vmax.f32 %v224_v27, 0.0 }
 0x2c9   :  { %v228_v28 = vpop.permute.xlu1 %227 }
 0x2ca   :  { %3169 = vmatmul.mubr.msk.f32.vlgmr.msra.gmra.mrb[2].mxu1 %vm126_vm2, %v228_v28 }
 0x2cb   :  { %3172 = vmatpush3.msra.mxu1 %v3737_v5  ;;  %3173 = vmatprep.mubr.msk.f32.mxu1 %vm3686_vm1, %v3685_v4 }
 0x2cc   :  { %3176 = vmatprep.subr.mxu1 %v3685_v4 }
 0x39d   :  { %v297_v29 = vpop.f32.mrb[2].mxu1 }
 0x39e   :  { %v302_v30 = vrot.slane %v297_v29, 6  ;;  %v3170_v31 = vpop.f32.mrb[3].mxu1 }
 0x3a0   :  { %v304_v32 = vadd.f32 %v302_v30, %v3762_v13 }
 0x3a2   :  { %3477 = vtanh.f32 %v304_v32  ;;  %v3005_v34 = vmul.f32 -1.442695, %v304_v32 }
 0x3a4   :  { %3479 = vpow2.f32 %v3005_v34 }
 0x3ac   :  { %v3478_v33 = vpop.eup %3477 }
 0x3ad   :  { %317 = vrot.lane.b32.xlu0 %v3478_v33, %s3687_s26 }
 0x3ae   :  { %v3480_v35 = vpop.eup %3479 }
 0x3af   :  { %v308_v36 = vadd.f32 1.0, %v3480_v35 }
 0x3b1   :  { %3481 = vrcp.f32 %v308_v36 }
 0x3bb   :  { %v3482_v37 = vpop.eup %3481 }
 0x3bc   :  { %v315_v41 = vmul.f32 %v3482_v37, %v313_v40 }
 0x41f   :  { %v318_v38 = vpop.permute.xlu0 %317 }
 0x420   :  { %v320_v39 = vmul.f32 %v3482_v37, %v318_v38 }
 0x422   :  { %322 = vrot.lane.b32.xlu1 %v320_v39, %s3688_s27 }
 0x494   :  { %v323_v42 = vpop.permute.xlu1 %322 }
 0x495   :  { %v325_v43 = vadd.f32 %v323_v42, %v315_v41 }
 0x497   :  { %3483 = vtanh.f32 %v325_v43  ;;  %v421_v63 = vrot.slane %v325_v43, 6 }
 0x4a1   :  { %v3484_v44 = vpop.eup %3483 }
 0x4a2   :  { %328 = vrot.lane.b32.xlu0 %v3484_v44, %s3689_s28 }
 0x514   :  { %v329_v45 = vpop.permute.xlu0 %328 }
 0x515   :  { %v331_v46 = vmul.f32 %v3482_v37, %v329_v45 }
 0x517   :  { %v332_v48 = vmax.f32 %v331_v46, 0.0  ;;  %v334_v49 = vrot.slane %v331_v46, 2 }
 0x519   :  { %335 = vrot.lane.b32.xlu1 %v334_v49, %s3690_s29  ;;  %v978_v50 = vsel %vm977_vm3, %v225_v47, %v332_v48 }
 0x58b   :  { %v336_v51 = vpop.permute.xlu1 %335 }
 0x58c   :  { %3174 = vmatmul.mubr.msk.f32.vlgmr.msra.gmra.mrb[4].mxu1 %vm126_vm2, %v336_v51 }
 0x58d   :  { %3177 = vmatpush3.msra.mxu1 %v3737_v5  ;;  %3178 = vmatprep.mubr.msk.f32.mxu1 %vm3686_vm1, %v3685_v4 }
 0x58e   :  { %3186 = vmatprep.subr.mxu1 %v3685_v4 }
 0x65f   :  { %v405_v52 = vpop.f32.mrb[4].mxu1 }
 0x660   :  { %v410_v53 = vrot.slane %v405_v52, 4  ;;  %v3175_v54 = vpop.f32.mrb[5].mxu1 }
 0x662   :  { %v412_v55 = vadd.f32 %v410_v53, %v3762_v13 }
 0x664   :  { %3485 = vtanh.f32 %v412_v55  ;;  %v3007_v57 = vmul.f32 -1.442695, %v412_v55 }
 0x666   :  { %3487 = vpow2.f32 %v3007_v57 }
 0x66e   :  { %v3486_v56 = vpop.eup %3485 }
 0x66f   :  { %425 = vrot.lane.b32.xlu0 %v3486_v56, %s3687_s26 }
 0x670   :  { %v3488_v58 = vpop.eup %3487 }
 0x671   :  { %v416_v59 = vadd.f32 1.0, %v3488_v58 }
 0x673   :  { %3489 = vrcp.f32 %v416_v59 }
 0x67d   :  { %v3490_v60 = vpop.eup %3489 }
 0x67e   :  { %v423_v0 = vmul.f32 %v3490_v60, %v421_v63 }
 0x6e1   :  { %v426_v61 = vpop.permute.xlu0 %425 }
 0x6e2   :  { %v428_v62 = vmul.f32 %v3490_v60, %v426_v61 }
 0x6e4   :  { %430 = vrot.lane.b32.xlu1 %v428_v62, %s3688_s27 }
 0x756   :  { %v431_v1 = vpop.permute.xlu1 %430 }
 0x757   :  { %v433_v2 = vadd.f32 %v431_v1, %v423_v0 }
 0x759   :  { %3491 = vtanh.f32 %v433_v2  ;;  %v529_v25 = vrot.slane %v433_v2, 6 }
 0x763   :  { %v3492_v3 = vpop.eup %3491 }
 0x764   :  { %436 = vrot.lane.b32.xlu0 %v3492_v3, %s3689_s28 }
 0x7d6   :  { %v437_v6 = vpop.permute.xlu0 %436 }
 0x7d7   :  { %v439_v7 = vmul.f32 %v3490_v60, %v437_v6 }
 0x7d9   :  { %v440_v8 = vmax.f32 %v439_v7, 0.0  ;;  %v442_v9 = vrot.slane %v439_v7, 4 }
 0x7db   :  { %443 = vrot.lane.b32.xlu1 %v442_v9, %s3690_s29  ;;  %v980_v10 = vsel %vm979_vm4, %v978_v50, %v440_v8 }
 0x84d   :  { %v444_v12 = vpop.permute.xlu1 %443 }
 0x84e   :  { %3179 = vmatmul.mubr.msk.f32.vlgmr.msra.gmra.mrb[6].mxu1 %vm126_vm2, %v444_v12 }
 0x84f   :  { %3187 = vmatpush3.msra.mxu1 %v3737_v5  ;;  %3188 = vmatprep.mubr.msk.f32.mxu1 %vm3686_vm1, %v3685_v4 }
 0x850   :  { %3196 = vmatprep.subr.mxu1 %v3685_v4 }
 0x921   :  { %v513_v14 = vpop.f32.mrb[6].mxu1 }
 0x922   :  { %v518_v15 = vrot.slane %v513_v14, 2  ;;  %v3180_v16 = vpop.f32.mrb[7].mxu1 }
 0x924   :  { %v520_v17 = vadd.f32 %v518_v15, %v3762_v13 }
 0x926   :  { %3493 = vtanh.f32 %v520_v17  ;;  %v3009_v19 = vmul.f32 -1.442695, %v520_v17 }
 0x928   :  { %3495 = vpow2.f32 %v3009_v19 }
 0x930   :  { %v3494_v18 = vpop.eup %3493 }
 0x931   :  { %533 = vrot.lane.b32.xlu0 %v3494_v18, %s3687_s26 }
 0x932   :  { %v3496_v20 = vpop.eup %3495 }
 0x933   :  { %v524_v21 = vadd.f32 1.0, %v3496_v20 }
 0x935   :  { %3497 = vrcp.f32 %v524_v21 }
 0x93f   :  { %v3498_v22 = vpop.eup %3497 }
 0x940   :  { %v531_v26 = vmul.f32 %v3498_v22, %v529_v25 }
 0x9a3   :  { %v534_v23 = vpop.permute.xlu0 %533 }
 0x9a4   :  { %v536_v24 = vmul.f32 %v3498_v22, %v534_v23 }
 0x9a6   :  { %538 = vrot.lane.b32.xlu1 %v536_v24, %s3688_s27 }
 0xa18   :  { %v539_v27 = vpop.permute.xlu1 %538 }
 0xa19   :  { %v541_v28 = vadd.f32 %v539_v27, %v531_v26 }
 0xa1b   :  { %3499 = vtanh.f32 %v541_v28  ;;  %v634_v45 = vrot.slane %v541_v28, 6 }
 0xa25   :  { %v3500_v13 = vpop.eup %3499 }
 0xa26   :  { %544 = vrot.lane.b32.xlu0 %v3500_v13, %s3689_s28 }
 0xa98   :  { %v545_v29 = vpop.permute.xlu0 %544 }
 0xa99   :  { %v547_v30 = vmul.f32 %v3498_v22, %v545_v29 }
 0xa9b   :  { %v548_v31 = vmax.f32 %v547_v30, 0.0  ;;  %v550_v32 = vrot.slane %v547_v30, 6 }
 0xa9d   :  { %551 = vrot.lane.b32.xlu1 %v550_v32, %s3690_s29  ;;  %v3802_v33 = vsel %vm981_vm5, %v980_v10, %v548_v31 }
 0xb0f   :  { %v552_v34 = vpop.permute.xlu1 %551 }
 0xb10   :  { %3184 = vmatmul.mubr.msk.f32.vlgmr.msra.gmra.mrb[2].mxu0 %vm126_vm2, %v552_v34 }
 0xb11   :  { %3192 = vmatpush3.msra.mxu0 %v3737_v5  ;;  %3193 = vmatprep.mubr.msk.f32.mxu0 %vm3686_vm1, %v3685_v4 }
 0xbe3   :  { %v621_v35 = vpop.f32.mrb[2].mxu0 }
 0xbe4   :  { %v625_v36 = vadd.f32 %v621_v35, %v3760_v11  ;;  %v3185_v37 = vpop.f32.mrb[3].mxu0 }
 0xbe6   :  { %3501 = vtanh.f32 %v625_v36  ;;  %v3011_v39 = vmul.f32 -1.442695, %v625_v36 }
 0xbe8   :  { %3503 = vpow2.f32 %v3011_v39 }
 0xbf0   :  { %v3502_v38 = vpop.eup %3501 }
 0xbf1   :  { %638 = vrot.lane.b32.xlu0 %v3502_v38, %s3687_s26 }
 0xbf2   :  { %v3504_v40 = vpop.eup %3503 }
 0xbf3   :  { %v629_v41 = vadd.f32 1.0, %v3504_v40 }
 0xbf5   :  { %3505 = vrcp.f32 %v629_v41 }
 0xbff   :  { %v3506_v42 = vpop.eup %3505 }
 0xc00   :  { %v636_v46 = vmul.f32 %v3506_v42, %v634_v45 }
 0xc63   :  { %v639_v43 = vpop.permute.xlu0 %638 }
 0xc64   :  { %v641_v44 = vmul.f32 %v3506_v42, %v639_v43 }
 0xc66   :  { %643 = vrot.lane.b32.xlu1 %v641_v44, %s3688_s27 }
 0xcd8   :  { %v644_v47 = vpop.permute.xlu1 %643 }
 0xcd9   :  { %v646_v48 = vadd.f32 %v644_v47, %v636_v46 }
 0xcdb   :  { %3507 = vtanh.f32 %v646_v48  ;;  %v741_v63 = vrot.slane %v646_v48, 6 }
 0xce5   :  { %v3508_v49 = vpop.eup %3507 }
 0xce6   :  { %649 = vrot.lane.b32.xlu0 %v3508_v49, %s3689_s28 }
 0xd58   :  { %v650_v50 = vpop.permute.xlu0 %649 }
 0xd59   :  { %v652_v51 = vmul.f32 %v3506_v42, %v650_v50 }
 0xd5b   :  { %655 = vrot.lane.b32.xlu1 %v652_v51, %s3690_s29  ;;  %v653_v8 = vmax.f32 %v652_v51, 0.0 }
 0xdcd   :  { %v656_v52 = vpop.permute.xlu1 %655 }
 0xdce   :  { %3189 = vmatmul.mubr.msk.f32.vlgmr.msra.gmra.mrb[8].mxu1 %vm126_vm2, %v656_v52  ;;  %v27_v52 = vld [vmem:[%s4125_s2] sm:$0xff] }
 0xdcf   :  { %3197 = vmatpush3.msra.mxu1 %v3737_v5  ;;  %3198 = vmatprep.mubr.msk.f32.mxu1 %vm3686_vm1, %v3685_v4 }
 0xdd0   :  { %3201 = vmatprep.subr.mxu0 %v27_v52 }
 0xea1   :  { %v725_v53 = vpop.f32.mrb[8].mxu1 }
 0xea2   :  { %v730_v54 = vrot.slane %v725_v53, 6  ;;  %v3190_v55 = vpop.f32.mrb[9].mxu1  ;;  %v28_v53 = vld [vmem:[%s4125_s2 + $0x8] sm:$0xff] }
 0xea4   :  { %v732_v56 = vadd.f32 %v730_v54, %v3760_v11  ;;  %v3691_v54 = vmov 0.0|0.0  }
 0xea5   :  { %3372 = vmatprep.subr.bf16.mxu1 %v3691_v54 }
 0xea6   :  { %3509 = vtanh.f32 %v732_v56  ;;  %v3013_v58 = vmul.f32 -1.442695, %v732_v56 }
 0xea8   :  { %3511 = vpow2.f32 %v3013_v58 }
 0xeb0   :  { %v3510_v57 = vpop.eup %3509 }
 0xeb1   :  { %745 = vrot.lane.b32.xlu0 %v3510_v57, %s3687_s26 }
 0xeb2   :  { %v3512_v59 = vpop.eup %3511 }
 0xeb3   :  { %v736_v60 = vadd.f32 1.0, %v3512_v59 }
 0xeb5   :  { %3513 = vrcp.f32 %v736_v60 }
 0xebf   :  { %v3514_v61 = vpop.eup %3513 }
 0xec0   :  { %v743_v0 = vmul.f32 %v3514_v61, %v741_v63  ;;  %v3018_v63 = vld [vmem:[%s4125_s2 + $0x18] ss:$0 sm:$0xff] }
 0xf23   :  { %v746_v62 = vpop.permute.xlu0 %745 }
 0xf24   :  { %v748_v5 = vmul.f32 %v3514_v61, %v746_v62 }
 0xf26   :  { %750 = vrot.lane.b32.xlu1 %v748_v5, %s3688_s27 }
 0xf98   :  { %v751_v1 = vpop.permute.xlu1 %750 }
 0xf99   :  { %v753_v2 = vadd.f32 %v751_v1, %v743_v0 }
 0xf9b   :  { %3515 = vtanh.f32 %v753_v2  ;;  %v849_v26 = vrot.slane %v753_v2, 6 }
 0xfa5   :  { %v3516_v3 = vpop.eup %3515 }
 0xfa6   :  { %756 = vrot.lane.b32.xlu0 %v3516_v3, %s3689_s28 }
0x1018   :  { %v757_v6 = vpop.permute.xlu0 %756 }
0x1019   :  { %v759_v7 = vmul.f32 %v3514_v61, %v757_v6 }
0x101b   :  { %v760_v9 = vmax.f32 %v759_v7, 0.0  ;;  %v762_v10 = vrot.slane %v759_v7, 2 }
0x101d   :  { %763 = vrot.lane.b32.xlu1 %v762_v10, %s3690_s29  ;;  %v983_v12 = vsel %vm977_vm3, %v653_v8, %v760_v9 }
0x108f   :  { %v764_v14 = vpop.permute.xlu1 %763 }
0x1090   :  { %3194 = vmatmul.mubr.msk.f32.vlgmr.msra.gmra.mrb[4].mxu0 %vm126_vm2, %v764_v14 }
0x1091   :  { %3202 = vmatpush3.msra.mxu0 %v27_v52 }
0x1092   :  { %3375 = vmatprep.subr.bf16.mxu0 %v3691_v54 }
0x1163   :  { %v833_v15 = vpop.f32.mrb[4].mxu0 }
0x1164   :  { %v838_v16 = vrot.slane %v833_v15, 4  ;;  %v3195_v17 = vpop.f32.mrb[5].mxu0 }
0x1166   :  { %v840_v18 = vadd.f32 %v838_v16, %v3760_v11 }
0x1168   :  { %3517 = vtanh.f32 %v840_v18  ;;  %v3015_v20 = vmul.f32 -1.442695, %v840_v18 }
0x116a   :  { %3519 = vpow2.f32 %v3015_v20 }
0x1172   :  { %v3518_v19 = vpop.eup %3517 }
0x1173   :  { %853 = vrot.lane.b32.xlu0 %v3518_v19, %s3687_s26 }
0x1174   :  { %v3520_v21 = vpop.eup %3519 }
0x1175   :  { %v844_v22 = vadd.f32 1.0, %v3520_v21 }
0x1177   :  { %3521 = vrcp.f32 %v844_v22 }
0x1181   :  { %v3522_v23 = vpop.eup %3521 }
0x1182   :  { %v851_v27 = vmul.f32 %v3522_v23, %v849_v26 }
0x11e5   :  { %v854_v24 = vpop.permute.xlu0 %853 }
0x11e6   :  { %v856_v25 = vmul.f32 %v3522_v23, %v854_v24 }
0x11e8   :  { %858 = vrot.lane.b32.xlu1 %v856_v25, %s3688_s27 }
0x125a   :  { %v859_v28 = vpop.permute.xlu1 %858 }
0x125b   :  { %v861_v13 = vadd.f32 %v859_v28, %v851_v27 }
0x125d   :  { %3523 = vtanh.f32 %v861_v13  ;;  %v957_v48 = vrot.slane %v861_v13, 6 }
0x1267   :  { %v3524_v29 = vpop.eup %3523 }
0x1268   :  { %864 = vrot.lane.b32.xlu0 %v3524_v29, %s3689_s28 }
0x12da   :  { %v865_v30 = vpop.permute.xlu0 %864 }
0x12db   :  { %v867_v31 = vmul.f32 %v3522_v23, %v865_v30 }
0x12dd   :  { %v868_v32 = vmax.f32 %v867_v31, 0.0  ;;  %v870_v34 = vrot.slane %v867_v31, 4 }
0x12df   :  { %871 = vrot.lane.b32.xlu1 %v870_v34, %s3690_s29  ;;  %v984_v35 = vsel %vm979_vm4, %v983_v12, %v868_v32 }
0x1351   :  { %v872_v36 = vpop.permute.xlu1 %871 }
0x1352   :  { %3199 = vmatmul.mubr.msk.f32.vlgmr.msra.gmra.mrb[10].mxu1 %vm126_vm2, %v872_v36 }
0x1353   :  { %3210 = vmatprep.mubr.msk.f32.mxu1 %vm3686_vm1, %v3685_v4 }
0x1425   :  { %v941_v37 = vpop.f32.mrb[10].mxu1 }
0x1426   :  { %v946_v38 = vrot.slane %v941_v37, 2  ;;  %v3200_v39 = vpop.f32.mrb[11].mxu1 }
0x1428   :  { %v948_v40 = vadd.f32 %v946_v38, %v3760_v11 }
0x142a   :  { %3525 = vtanh.f32 %v948_v40  ;;  %v3017_v42 = vmul.f32 -1.442695, %v948_v40 }
0x142c   :  { %3527 = vpow2.f32 %v3017_v42 }
0x1434   :  { %v3526_v41 = vpop.eup %3525 }
0x1435   :  { %961 = vrot.lane.b32.xlu0 %v3526_v41, %s3687_s26 }
0x1436   :  { %v3528_v43 = vpop.eup %3527 }
0x1437   :  { %v952_v44 = vadd.f32 1.0, %v3528_v43 }
0x1439   :  { %3529 = vrcp.f32 %v952_v44 }
0x1443   :  { %v3530_v45 = vpop.eup %3529 }
0x1444   :  { %v959_v49 = vmul.f32 %v3530_v45, %v957_v48 }
0x14a7   :  { %v962_v46 = vpop.permute.xlu0 %961 }
0x14a8   :  { %v964_v47 = vmul.f32 %v3530_v45, %v962_v46 }
0x14aa   :  { %966 = vrot.lane.b32.xlu1 %v964_v47, %s3688_s27 }
0x14ae   :  { %992 = vrot.lane.b32.xlu1 %v3802_v33, %s3690_s29  ;;  %v29_v33 = vld [vmem:[%s4125_s2 + $0x10] sm:$0xff]  ;;  %s3693_s2 = smov 32  }
0x14af   :  { %v3849_v55 = vpack.c.bf16 %v29_v33, %v28_v53 }
0x14b1   :  { %3374 = vmatpush3.bf16.msra.mxu1 %v3849_v55 }
0x14b2   :  { %3378 = vmatprep.subr.bf16.mxu1 %v3691_v54 }
0x14b4   :  { %3211 = vmatmul.mubr.f32.vlgmr.msra.gmra.mrb[12].mxu1 %v3685_v4 }
0x14b5   :  { %3380 = vmatpush3.bf16.msra.mxu1 %v3849_v55  ;;  %3224 = vmatprep.mubr.msk.f32.mxu1 %vm3686_vm1, %v3685_v4 }
0x14b6   :  { %3384 = vmatprep.subr.bf16.mxu1 %v3691_v54 }
0x151c   :  { %v967_v11 = vpop.permute.xlu1 %966 }
0x151d   :  { %v969_v50 = vadd.f32 %v967_v11, %v959_v49 }
0x151f   :  { %3531 = vtanh.f32 %v969_v50 }
0x1520   :  { %v993_v51 = vpop.permute.xlu1 %992 }
0x1521   :  { %3203 = vmatprep.mubr.msk.f32.mxu0 %vm126_vm2, %v993_v51 }
0x1529   :  { %v3532_v56 = vpop.eup %3531 }
0x152a   :  { %972 = vrot.lane.b32.xlu0 %v3532_v56, %s3689_s28 }
0x1587   :  { %v1143_v62 = vpop.f32.mrb[12].mxu1 }
0x1588   :  { %v3212_v5 = vpop.f32.mrb[13].mxu1 }
0x159c   :  { %v973_v57 = vpop.permute.xlu0 %972 }
0x159d   :  { %v975_v58 = vmul.f32 %v3530_v45, %v973_v57 }
0x159f   :  { %v976_v59 = vmax.f32 %v975_v58, 0.0 }
0x15a1   :  { %v985_v60 = vsel %vm981_vm5, %v984_v35, %v976_v59 }
0x15a2   :  { %994 = vrot.lane.b32.xlu0 %v985_v60, %s3690_s29 }
0x1614   :  { %v995_v61 = vpop.permute.xlu0 %994 }
0x1615   :  { %3204 = vmatmul.mubr.msk.f32.vlgmr.msra.gmra.mrb[6].mxu0 %vm126_vm2, %v995_v61 }
0x1616   :  { %3377 = vmatpush3.bf16.msra.mxu0 %v3849_v55  ;;  %3217 = vmatprep.mubr.msk.f32.mxu0 %vm3686_vm1, %v3685_v4 }
0x1617   :  { %3381 = vmatprep.subr.bf16.mxu0 %v3691_v54 }
0x16e8   :  { %v3205_v0 = vpop.f32.mrb[6].mxu0 }
0x16e9   :  { %v3870_v1 = vadd.f32 %v3205_v0, %v3018_v63  ;;  %v1066_v2 = vpop.f32.mrb[7].mxu0 }
0x16ea   :  { %v3872_v3 = vadd.f32 %v3018_v63, %v1066_v2 }
0x16ec   :  { %v1147_v6 = vadd.f32 %v1143_v62, %v3872_v3 }
0x16ee   :  { %3533 = vtanh.f32 %v1147_v6  ;;  %v3021_v8 = vmul.f32 -1.442695, %v1147_v6 }
0x16f0   :  { %3535 = vpow2.f32 %v3021_v8 }
0x16f8   :  { %v3534_v7 = vpop.eup %3533 }
0x16f9   :  { %1157 = vrot.lane.b32.xlu1 %v3534_v7, %s3692_s12 }
0x16fa   :  { %v3536_v9 = vpop.eup %3535 }
0x16fb   :  { %v1151_v10 = vadd.f32 1.0, %v3536_v9 }
0x16fd   :  { %3537 = vrcp.f32 %v1151_v10 }
0x1707   :  { %v3538_v12 = vpop.eup %3537 }
0x1708   :  { %v1155_v16 = vmul.f32 0.0, %v3538_v12 }
0x176b   :  { %v1158_v14 = vpop.permute.xlu1 %1157 }
0x176c   :  { %v1160_v15 = vmul.f32 %v3538_v12, %v1158_v14 }
0x176e   :  { %1162 = vrot.lane.b32.xlu0 %v1160_v15, %s3689_s28 }
0x17e0   :  { %v1163_v17 = vpop.permute.xlu0 %1162 }
0x17e1   :  { %v1165_v18 = vadd.f32 %v1163_v17, %v1155_v16 }
0x17e3   :  { %3539 = vtanh.f32 %v1165_v18  ;;  %v1260_v34 = vrot.slane %v1165_v18, 6 }
0x17ed   :  { %v3540_v19 = vpop.eup %3539 }
0x17ee   :  { %1168 = vrot.lane.b32.xlu1 %v3540_v19, %s3693_s2 }
0x1860   :  { %v1169_v20 = vpop.permute.xlu1 %1168 }
0x1861   :  { %v1171_v21 = vmul.f32 %v3538_v12, %v1169_v20 }
0x1863   :  { %1174 = vrot.lane.b32.xlu0 %v1171_v21, %s3694_s13  ;;  %v1172_v41 = vmax.f32 %v1171_v21, 0.0 }
0x18d5   :  { %v1175_v22 = vpop.permute.xlu0 %1174 }
0x18d6   :  { %3218 = vmatmul.mubr.msk.f32.vlgmr.msra.gmra.mrb[8].mxu0 %vm44_vm0, %v1175_v22 }
0x18d7   :  { %3383 = vmatpush3.bf16.msra.mxu0 %v3849_v55  ;;  %3231 = vmatprep.mubr.msk.f32.mxu0 %vm3686_vm1, %v3685_v4 }
0x18d8   :  { %3387 = vmatprep.subr.bf16.mxu0 %v3691_v54 }
0x19a9   :  { %v1244_v23 = vpop.f32.mrb[8].mxu0 }
0x19aa   :  { %v1249_v24 = vrot.slane %v1244_v23, 6  ;;  %v3219_v25 = vpop.f32.mrb[9].mxu0 }
0x19ac   :  { %v1251_v26 = vadd.f32 %v1249_v24, %v3872_v3 }
0x19ae   :  { %3541 = vtanh.f32 %v1251_v26  ;;  %v3023_v28 = vmul.f32 -1.442695, %v1251_v26 }
0x19b0   :  { %3543 = vpow2.f32 %v3023_v28 }
0x19b8   :  { %v3542_v27 = vpop.eup %3541 }
0x19b9   :  { %1264 = vrot.lane.b32.xlu1 %v3542_v27, %s3692_s12 }
0x19ba   :  { %v3544_v13 = vpop.eup %3543 }
0x19bb   :  { %v1255_v29 = vadd.f32 1.0, %v3544_v13 }
0x19bd   :  { %3545 = vrcp.f32 %v1255_v29 }
0x19c7   :  { %v3546_v30 = vpop.eup %3545 }
0x19c8   :  { %v1262_v35 = vmul.f32 %v3546_v30, %v1260_v34 }
0x1a2b   :  { %v1265_v31 = vpop.permute.xlu1 %1264 }
0x1a2c   :  { %v1267_v32 = vmul.f32 %v3546_v30, %v1265_v31 }
0x1a2e   :  { %1269 = vrot.lane.b32.xlu0 %v1267_v32, %s3689_s28 }
0x1aa0   :  { %v1270_v36 = vpop.permute.xlu0 %1269 }
0x1aa1   :  { %v1272_v37 = vadd.f32 %v1270_v36, %v1262_v35 }
0x1aa3   :  { %3547 = vtanh.f32 %v1272_v37  ;;  %v1368_v57 = vrot.slane %v1272_v37, 6 }
0x1aad   :  { %v3548_v38 = vpop.eup %3547 }
0x1aae   :  { %1275 = vrot.lane.b32.xlu1 %v3548_v38, %s3693_s2 }
0x1b20   :  { %v1276_v39 = vpop.permute.xlu1 %1275 }
0x1b21   :  { %v1278_v40 = vmul.f32 %v3546_v30, %v1276_v39 }
0x1b23   :  { %v1279_v42 = vmax.f32 %v1278_v40, 0.0  ;;  %v1281_v43 = vrot.slane %v1278_v40, 2 }
0x1b25   :  { %1282 = vrot.lane.b32.xlu0 %v1281_v43, %s3694_s13  ;;  %v1924_v44 = vsel %vm977_vm3, %v1172_v41, %v1279_v42 }
0x1b97   :  { %v1283_v45 = vpop.permute.xlu0 %1282 }
0x1b98   :  { %3225 = vmatmul.mubr.msk.f32.vlgmr.msra.gmra.mrb[14].mxu1 %vm44_vm0, %v1283_v45 }
0x1b99   :  { %3386 = vmatpush3.bf16.msra.mxu1 %v3849_v55  ;;  %3238 = vmatprep.mubr.msk.f32.mxu1 %vm3686_vm1, %v3685_v4 }
0x1b9a   :  { %3390 = vmatprep.subr.bf16.mxu1 %v3691_v54 }
0x1c6b   :  { %v1352_v46 = vpop.f32.mrb[14].mxu1 }
0x1c6c   :  { %v1357_v47 = vrot.slane %v1352_v46, 4  ;;  %v3226_v48 = vpop.f32.mrb[15].mxu1 }
0x1c6e   :  { %v1359_v49 = vadd.f32 %v1357_v47, %v3872_v3 }
0x1c70   :  { %3549 = vtanh.f32 %v1359_v49  ;;  %v3025_v50 = vmul.f32 -1.442695, %v1359_v49 }
0x1c72   :  { %3551 = vpow2.f32 %v3025_v50 }
0x1c7a   :  { %v3550_v11 = vpop.eup %3549 }
0x1c7b   :  { %1372 = vrot.lane.b32.xlu1 %v3550_v11, %s3692_s12 }
0x1c7c   :  { %v3552_v51 = vpop.eup %3551 }
0x1c7d   :  { %v1363_v52 = vadd.f32 1.0, %v3552_v51 }
0x1c7f   :  { %3553 = vrcp.f32 %v1363_v52 }
0x1c89   :  { %v3554_v53 = vpop.eup %3553 }
0x1c8a   :  { %v1370_v58 = vmul.f32 %v3554_v53, %v1368_v57 }
0x1ced   :  { %v1373_v33 = vpop.permute.xlu1 %1372 }
0x1cee   :  { %v1375_v56 = vmul.f32 %v3554_v53, %v1373_v33 }
0x1cf0   :  { %1377 = vrot.lane.b32.xlu0 %v1375_v56, %s3689_s28 }
0x1d62   :  { %v1378_v59 = vpop.permute.xlu0 %1377 }
0x1d63   :  { %v1380_v60 = vadd.f32 %v1378_v59, %v1370_v58 }
0x1d65   :  { %3555 = vtanh.f32 %v1380_v60  ;;  %v1476_v20 = vrot.slane %v1380_v60, 6 }
0x1d6f   :  { %v3556_v61 = vpop.eup %3555 }
0x1d70   :  { %1383 = vrot.lane.b32.xlu1 %v3556_v61, %s3693_s2 }
0x1de2   :  { %v1384_v62 = vpop.permute.xlu1 %1383 }
0x1de3   :  { %v1386_v5 = vmul.f32 %v3554_v53, %v1384_v62 }
0x1de5   :  { %v1387_v63 = vmax.f32 %v1386_v5, 0.0  ;;  %v1389_v0 = vrot.slane %v1386_v5, 4 }
0x1de7   :  { %1390 = vrot.lane.b32.xlu0 %v1389_v0, %s3694_s13  ;;  %v1925_v2 = vsel %vm979_vm4, %v1924_v44, %v1387_v63 }
0x1e59   :  { %v1391_v6 = vpop.permute.xlu0 %1390 }
0x1e5a   :  { %3232 = vmatmul.mubr.msk.f32.vlgmr.msra.gmra.mrb[10].mxu0 %vm44_vm0, %v1391_v6 }
0x1e5b   :  { %3389 = vmatpush3.bf16.msra.mxu0 %v3849_v55  ;;  %3245 = vmatprep.mubr.msk.f32.mxu0 %vm3686_vm1, %v3685_v4 }
0x1e5c   :  { %3393 = vmatprep.subr.bf16.mxu0 %v3691_v54 }
0x1f2d   :  { %v1460_v7 = vpop.f32.mrb[10].mxu0 }
0x1f2e   :  { %v1465_v8 = vrot.slane %v1460_v7, 2  ;;  %v3233_v9 = vpop.f32.mrb[11].mxu0 }
0x1f30   :  { %v1467_v10 = vadd.f32 %v1465_v8, %v3872_v3 }
0x1f32   :  { %3557 = vtanh.f32 %v1467_v10  ;;  %v3027_v14 = vmul.f32 -1.442695, %v1467_v10 }
0x1f34   :  { %3559 = vpow2.f32 %v3027_v14 }
0x1f3c   :  { %v3558_v12 = vpop.eup %3557 }
0x1f3d   :  { %1480 = vrot.lane.b32.xlu1 %v3558_v12, %s3692_s12 }
0x1f3e   :  { %v3560_v15 = vpop.eup %3559 }
0x1f3f   :  { %v1471_v16 = vadd.f32 1.0, %v3560_v15 }
0x1f41   :  { %3561 = vrcp.f32 %v1471_v16 }
0x1f4b   :  { %v3562_v17 = vpop.eup %3561 }
0x1f4c   :  { %v1478_v21 = vmul.f32 %v3562_v17, %v1476_v20 }
0x1faf   :  { %v1481_v18 = vpop.permute.xlu1 %1480 }
0x1fb0   :  { %v1483_v19 = vmul.f32 %v3562_v17, %v1481_v18 }
0x1fb2   :  { %1485 = vrot.lane.b32.xlu0 %v1483_v19, %s3689_s28 }
0x2024   :  { %v1486_v22 = vpop.permute.xlu0 %1485 }
0x2025   :  { %v1488_v23 = vadd.f32 %v1486_v22, %v1478_v21 }
0x2027   :  { %3563 = vtanh.f32 %v1488_v23  ;;  %v1581_v40 = vrot.slane %v1488_v23, 6 }
0x2031   :  { %v3564_v3 = vpop.eup %3563 }
0x2032   :  { %1491 = vrot.lane.b32.xlu1 %v3564_v3, %s3693_s2 }
0x20a4   :  { %v1492_v24 = vpop.permute.xlu1 %1491 }
0x20a5   :  { %v1494_v25 = vmul.f32 %v3562_v17, %v1492_v24 }
0x20a7   :  { %v1495_v26 = vmax.f32 %v1494_v25, 0.0  ;;  %v1497_v27 = vrot.slane %v1494_v25, 6 }
0x20a9   :  { %1498 = vrot.lane.b32.xlu0 %v1497_v27, %s3694_s13  ;;  %v3912_v28 = vsel %vm981_vm5, %v1925_v2, %v1495_v26 }
0x211b   :  { %v1499_v13 = vpop.permute.xlu0 %1498 }
0x211c   :  { %3239 = vmatmul.mubr.msk.f32.vlgmr.msra.gmra.mrb[16].mxu1 %vm44_vm0, %v1499_v13 }
0x211d   :  { %3392 = vmatpush3.bf16.msra.mxu1 %v3849_v55  ;;  %3252 = vmatprep.mubr.msk.f32.mxu1 %vm3686_vm1, %v3685_v4 }
0x21ef   :  { %v1568_v29 = vpop.f32.mrb[16].mxu1 }
0x21f0   :  { %v1572_v30 = vadd.f32 %v1568_v29, %v3870_v1  ;;  %v3240_v31 = vpop.f32.mrb[17].mxu1 }
0x21f2   :  { %3565 = vtanh.f32 %v1572_v30  ;;  %v3029_v34 = vmul.f32 -1.442695, %v1572_v30 }
0x21f4   :  { %3567 = vpow2.f32 %v3029_v34 }
0x21fc   :  { %v3566_v32 = vpop.eup %3565 }
0x21fd   :  { %1585 = vrot.lane.b32.xlu1 %v3566_v32, %s3692_s12 }
0x21fe   :  { %v3568_v35 = vpop.eup %3567 }
0x21ff   :  { %v1576_v36 = vadd.f32 1.0, %v3568_v35 }
0x2201   :  { %3569 = vrcp.f32 %v1576_v36 }
0x220b   :  { %v3570_v37 = vpop.eup %3569 }
0x220c   :  { %v1583_v41 = vmul.f32 %v3570_v37, %v1581_v40 }
0x226f   :  { %v1586_v38 = vpop.permute.xlu1 %1585 }
0x2270   :  { %v1588_v39 = vmul.f32 %v3570_v37, %v1586_v38 }
0x2272   :  { %1590 = vrot.lane.b32.xlu0 %v1588_v39, %s3689_s28 }
0x22e4   :  { %v1591_v42 = vpop.permute.xlu0 %1590 }
0x22e5   :  { %v1593_v43 = vadd.f32 %v1591_v42, %v1583_v41 }
0x22e7   :  { %3571 = vtanh.f32 %v1593_v43  ;;  %v1688_v58 = vrot.slane %v1593_v43, 6 }
0x22f1   :  { %v3572_v44 = vpop.eup %3571 }
0x22f2   :  { %1596 = vrot.lane.b32.xlu1 %v3572_v44, %s3693_s2 }
0x2364   :  { %v1597_v45 = vpop.permute.xlu1 %1596 }
0x2365   :  { %v1599_v46 = vmul.f32 %v3570_v37, %v1597_v45 }
0x2367   :  { %1602 = vrot.lane.b32.xlu0 %v1599_v46, %s3694_s13  ;;  %v1600_v0 = vmax.f32 %v1599_v46, 0.0 }
0x23d9   :  { %v1603_v47 = vpop.permute.xlu0 %1602 }
0x23da   :  { %3246 = vmatmul.mubr.msk.f32.vlgmr.msra.gmra.mrb[12].mxu0 %vm44_vm0, %v1603_v47 }
0x23db   :  { %3395 = vmatpush3.bf16.msra.mxu0 %v3849_v55  ;;  %3259 = vmatprep.mubr.msk.f32.mxu0 %vm3686_vm1, %v3685_v4 }
0x23dc   :  { %3400 = vmatprep.subr.bf16.mxu0 %v3691_v54 }
0x24ad   :  { %v1672_v48 = vpop.f32.mrb[12].mxu0 }
0x24ae   :  { %v1677_v49 = vrot.slane %v1672_v48, 6  ;;  %v3247_v11 = vpop.f32.mrb[13].mxu0  ;;  %v31_v48 = vld [vmem:[%s4126_s3] sm:$0xff] }
0x24b0   :  { %v1679_v50 = vadd.f32 %v1677_v49, %v3870_v1  ;;  %v32_v49 = vld [vmem:[%s4126_s3 + $0x8] sm:$0xff] }
0x24b1   :  { %v3396_v11 = vpack.c.bf16 %v32_v49, %v31_v48 }
0x24b2   :  { %3573 = vtanh.f32 %v1679_v50  ;;  %v3031_v52 = vmul.f32 -1.442695, %v1679_v50  ;;  %v34_v50 = vld [vmem:[%s4126_s3 + $0x18] sm:$0xff] }
0x24b3   :  { %3397 = vmatprep.subr.bf16.mxu1 %v3396_v11 }
0x24b4   :  { %3575 = vpow2.f32 %v3031_v52  ;;  %v36_v52 = vld [vmem:[%s4126_s3 + $0x28] sm:$0xff] }
0x24bc   :  { %v3574_v51 = vpop.eup %3573 }
0x24bd   :  { %1692 = vrot.lane.b32.xlu1 %v3574_v51, %s3692_s12  ;;  %v35_v51 = vld [vmem:[%s4126_s3 + $0x20] sm:$0xff] }
0x24be   :  { %v3576_v53 = vpop.eup %3575 }
0x24bf   :  { %v1683_v33 = vadd.f32 1.0, %v3576_v53 }
0x24c1   :  { %3577 = vrcp.f32 %v1683_v33  ;;  %v3971_v33 = vpack.c.bf16 %v36_v52, %v35_v51 }
0x24cb   :  { %v3578_v55 = vpop.eup %3577 }
0x24cc   :  { %v1690_v59 = vmul.f32 %v3578_v55, %v1688_v58 }
0x252f   :  { %v1693_v56 = vpop.permute.xlu1 %1692 }
0x2530   :  { %v1695_v57 = vmul.f32 %v3578_v55, %v1693_v56 }
0x2532   :  { %1697 = vrot.lane.b32.xlu0 %v1695_v57, %s3689_s28 }
0x25a4   :  { %v1698_v60 = vpop.permute.xlu0 %1697 }
0x25a5   :  { %v1700_v61 = vadd.f32 %v1698_v60, %v1690_v59 }
0x25a7   :  { %3579 = vtanh.f32 %v1700_v61  ;;  %v1796_v22 = vrot.slane %v1700_v61, 6 }
0x25b1   :  { %v3580_v62 = vpop.eup %3579 }
0x25b2   :  { %1703 = vrot.lane.b32.xlu1 %v3580_v62, %s3693_s2 }
0x2624   :  { %v1704_v5 = vpop.permute.xlu1 %1703 }
0x2625   :  { %v1706_v63 = vmul.f32 %v3578_v55, %v1704_v5  ;;  %v3036_v5 = vld [vmem:[%s4126_s3 + $0x30] ss:$0 sm:$0xff] }
0x2627   :  { %v1707_v2 = vmax.f32 %v1706_v63, 0.0  ;;  %v1709_v6 = vrot.slane %v1706_v63, 2 }
0x2629   :  { %1710 = vrot.lane.b32.xlu0 %v1709_v6, %s3694_s13  ;;  %v1927_v7 = vsel %vm977_vm3, %v1600_v0, %v1707_v2 }
0x269b   :  { %v1711_v8 = vpop.permute.xlu0 %1710 }
0x269c   :  { %3253 = vmatmul.mubr.msk.f32.vlgmr.msra.gmra.mrb[18].mxu1 %vm44_vm0, %v1711_v8 }
0x269d   :  { %3399 = vmatpush3.bf16.msra.mxu1 %v3396_v11 }
0x269e   :  { %3406 = vmatprep.subr.bf16.mxu1 %v3691_v54 }
0x276f   :  { %v1780_v9 = vpop.f32.mrb[18].mxu1 }
0x2770   :  { %v1785_v10 = vrot.slane %v1780_v9, 4  ;;  %v3254_v12 = vpop.f32.mrb[19].mxu1 }
0x2772   :  { %v1787_v14 = vadd.f32 %v1785_v10, %v3870_v1 }
0x2774   :  { %3581 = vtanh.f32 %v1787_v14  ;;  %v3033_v16 = vmul.f32 -1.442695, %v1787_v14 }
0x2776   :  { %3583 = vpow2.f32 %v3033_v16 }
0x277e   :  { %v3582_v15 = vpop.eup %3581 }
0x277f   :  { %1800 = vrot.lane.b32.xlu1 %v3582_v15, %s3692_s12 }
0x2780   :  { %v3584_v17 = vpop.eup %3583 }
0x2781   :  { %v1791_v18 = vadd.f32 1.0, %v3584_v17 }
0x2783   :  { %3585 = vrcp.f32 %v1791_v18 }
0x278d   :  { %v3586_v19 = vpop.eup %3585 }
0x278e   :  { %v1798_v23 = vmul.f32 %v3586_v19, %v1796_v22 }
0x27f1   :  { %v1801_v20 = vpop.permute.xlu1 %1800 }
0x27f2   :  { %v1803_v21 = vmul.f32 %v3586_v19, %v1801_v20 }
0x27f4   :  { %1805 = vrot.lane.b32.xlu0 %v1803_v21, %s3689_s28 }
0x2866   :  { %v1806_v3 = vpop.permute.xlu0 %1805 }
0x2867   :  { %v1808_v24 = vadd.f32 %v1806_v3, %v1798_v23 }
0x2869   :  { %3587 = vtanh.f32 %v1808_v24  ;;  %v1904_v44 = vrot.slane %v1808_v24, 6 }
0x2873   :  { %v3588_v25 = vpop.eup %3587 }
0x2874   :  { %1811 = vrot.lane.b32.xlu1 %v3588_v25, %s3693_s2 }
0x28e6   :  { %v1812_v26 = vpop.permute.xlu1 %1811 }
0x28e7   :  { %v1814_v27 = vmul.f32 %v3586_v19, %v1812_v26 }
0x28e9   :  { %v1815_v13 = vmax.f32 %v1814_v27, 0.0  ;;  %v1817_v29 = vrot.slane %v1814_v27, 4 }
0x28eb   :  { %1818 = vrot.lane.b32.xlu0 %v1817_v29, %s3694_s13  ;;  %v1928_v30 = vsel %vm979_vm4, %v1927_v7, %v1815_v13 }
0x295d   :  { %v1819_v31 = vpop.permute.xlu0 %1818 }
0x295e   :  { %3260 = vmatmul.mubr.msk.f32.vlgmr.msra.gmra.mrb[14].mxu0 %vm44_vm0, %v1819_v31 }
0x295f   :  { %3277 = vmatprep.mubr.msk.f32.mxu0 %vm3686_vm1, %v3685_v4 }
0x2a31   :  { %v1888_v32 = vpop.f32.mrb[14].mxu0 }
0x2a32   :  { %v1893_v34 = vrot.slane %v1888_v32, 2  ;;  %v3261_v35 = vpop.f32.mrb[15].mxu0 }
0x2a34   :  { %v1895_v36 = vadd.f32 %v1893_v34, %v3870_v1 }
0x2a36   :  { %3589 = vtanh.f32 %v1895_v36  ;;  %v3035_v38 = vmul.f32 -1.442695, %v1895_v36 }
0x2a38   :  { %3591 = vpow2.f32 %v3035_v38 }
0x2a40   :  { %v3590_v37 = vpop.eup %3589 }
0x2a41   :  { %1908 = vrot.lane.b32.xlu1 %v3590_v37, %s3692_s12 }
0x2a42   :  { %v3592_v39 = vpop.eup %3591 }
0x2a43   :  { %v1899_v40 = vadd.f32 1.0, %v3592_v39 }
0x2a45   :  { %3593 = vrcp.f32 %v1899_v40 }
0x2a4f   :  { %v3594_v41 = vpop.eup %3593 }
0x2a50   :  { %v1906_v45 = vmul.f32 %v3594_v41, %v1904_v44 }
0x2ab3   :  { %v1909_v42 = vpop.permute.xlu1 %1908 }
0x2ab4   :  { %v1911_v43 = vmul.f32 %v3594_v41, %v1909_v42 }
0x2ab6   :  { %1913 = vrot.lane.b32.xlu0 %v1911_v43, %s3689_s28  ;;  %s3695_s28 = smov 64  }
0x2aba   :  { %1936 = vrot.lane.b32.xlu0 %v3912_v28, %s3694_s13  ;;  %v33_v28 = vld [vmem:[%s4126_s3 + $0x10] sm:$0xff] }
0x2abb   :  { %v3968_v53 = vpack.c.bf16 %v34_v50, %v33_v28 }
0x2abd   :  { %3402 = vmatpush3.bf16.msra.mxu0 %v3968_v53 }
0x2abe   :  { %3403 = vmatprep.subr.bf16.mxu0 %v3691_v54 }
0x2ac1   :  { %3405 = vmatpush3.bf16.msra.mxu0 %v3971_v33 }
0x2ac2   :  { %3412 = vmatprep.subr.bf16.mxu0 %v3691_v54 }
0x2ac4   :  { %3278 = vmatmul.mubr.f32.vlgmr.msra.gmra.mrb[16].mxu0 %v3685_v4 }
0x2ac5   :  { %3414 = vmatpush3.bf16.msra.mxu0 %v3968_v53  ;;  %3299 = vmatprep.mubr.msk.f32.mxu0 %vm3686_vm1, %v3685_v4 }
0x2ac6   :  { %3415 = vmatprep.subr.bf16.mxu0 %v3691_v54 }
0x2ac9   :  { %3417 = vmatpush3.bf16.msra.mxu0 %v3971_v33 }
0x2aca   :  { %3424 = vmatprep.subr.bf16.mxu0 %v3691_v54 }
0x2b28   :  { %v1914_v1 = vpop.permute.xlu0 %1913 }
0x2b29   :  { %v1916_v46 = vadd.f32 %v1914_v1, %v1906_v45 }
0x2b2b   :  { %3595 = vtanh.f32 %v1916_v46 }
0x2b2c   :  { %v1937_v47 = vpop.permute.xlu0 %1936 }
0x2b2d   :  { %3266 = vmatprep.mubr.msk.f32.mxu1 %vm44_vm0, %v1937_v47 }
0x2b35   :  { %v3596_v55 = vpop.eup %3595 }
0x2b36   :  { %1919 = vrot.lane.b32.xlu1 %v3596_v55, %s3693_s2 }
0x2b97   :  { %v2088_v61 = vpop.f32.mrb[16].mxu0 }
0x2b98   :  { %v3279_v62 = vpop.f32.mrb[17].mxu0 }
0x2ba8   :  { %v1920_v56 = vpop.permute.xlu1 %1919 }
0x2ba9   :  { %v1922_v57 = vmul.f32 %v3594_v41, %v1920_v56 }
0x2bab   :  { %v1923_v58 = vmax.f32 %v1922_v57, 0.0 }
0x2bad   :  { %v1929_v59 = vsel %vm981_vm5, %v1928_v30, %v1923_v58 }
0x2bae   :  { %1938 = vrot.lane.b32.xlu1 %v1929_v59, %s3694_s13  ;;  %s3696_s13 = smov [#allocation2]  }
0x2baf   :  { %s2989_s14 = sshll.u32 %s3696_s13, 4  ;;  %s2990_s14 = int_to_ptr.vmem [resolvable:$true] %s2989_s14 }
0x2bb0   :  { %p3666_p1 = scmp.lt.s32.totalorder %s2990_s14, %s2990_s14 }
0x2c20   :  { %v1939_v60 = vpop.permute.xlu1 %1938 }
0x2c21   :  { %3267 = vmatmul.mubr.msk.f32.vlgmr.msra.gmra.mrb[20].mxu1 %vm44_vm0, %v1939_v60 }
0x2c22   :  { %3408 = vmatpush3.bf16.msra.mxu1 %v3968_v53  ;;  %3288 = vmatprep.mubr.msk.f32.mxu1 %vm3686_vm1, %v3685_v4 }
0x2c23   :  { %3409 = vmatprep.subr.bf16.mxu1 %v3691_v54 }
0x2c26   :  { %3411 = vmatpush3.bf16.msra.mxu1 %v3971_v33 }
0x2c27   :  { %3418 = vmatprep.subr.bf16.mxu1 %v3691_v54 }
0x2cf4   :  { %v3268_v63 = vpop.f32.mrb[20].mxu1 }
0x2cf5   :  { %v3997_v0 = vadd.f32 %v3268_v63, %v3036_v5  ;;  %v2010_v2 = vpop.f32.mrb[21].mxu1 }
0x2cf6   :  { %v3999_v6 = vadd.f32 %v3036_v5, %v2010_v2 }
0x2cf8   :  { %v2092_v7 = vadd.f32 %v2088_v61, %v3999_v6 }
0x2cfa   :  { %3597 = vtanh.f32 %v2092_v7  ;;  %v3039_v9 = vmul.f32 -1.442695, %v2092_v7 }
0x2cfc   :  { %3599 = vpow2.f32 %v3039_v9 }
0x2d04   :  { %v3598_v8 = vpop.eup %3597 }
0x2d05   :  { %2102 = vrot.lane.b32.xlu0 %v3598_v8, %s3695_s28 }
0x2d06   :  { %v3600_v10 = vpop.eup %3599 }
0x2d07   :  { %v2096_v12 = vadd.f32 1.0, %v3600_v10 }
0x2d09   :  { %3601 = vrcp.f32 %v2096_v12 }
0x2d13   :  { %v3602_v14 = vpop.eup %3601 }
0x2d14   :  { %v2100_v17 = vmul.f32 0.0, %v3602_v14 }
0x2d77   :  { %v2103_v15 = vpop.permute.xlu0 %2102 }
0x2d78   :  { %v2105_v16 = vmul.f32 %v3602_v14, %v2103_v15 }
0x2d7a   :  { %2107 = vrot.lane.b32.xlu1 %v2105_v16, %s3693_s2 }
0x2dec   :  { %v2108_v18 = vpop.permute.xlu1 %2107 }
0x2ded   :  { %v2110_v19 = vadd.f32 %v2108_v18, %v2100_v17 }
0x2def   :  { %3603 = vtanh.f32 %v2110_v19  ;;  %v2205_v35 = vrot.slane %v2110_v19, 6 }
0x2df9   :  { %v3604_v20 = vpop.eup %3603 }
0x2dfa   :  { %2113 = vrot.lane.b32.xlu0 %v3604_v20, %s3695_s28 }
0x2e6c   :  { %v2114_v21 = vpop.permute.xlu0 %2113 }
0x2e6d   :  { %v2116_v22 = vmul.f32 %v3602_v14, %v2114_v21 }
0x2e6f   :  { %2119 = vrot.lane.b32.xlu1 %v2116_v22, %s3693_s2  ;;  %v2117_v42 = vmax.f32 %v2116_v22, 0.0 }
0x2ee1   :  { %v2120_v23 = vpop.permute.xlu1 %2119 }
0x2ee2   :  { %3289 = vmatmul.mubr.msk.f32.vlgmr.msra.gmra.mrb[22].mxu1 %vm2019_vm6, %v2120_v23 }
0x2ee3   :  { %3420 = vmatpush3.bf16.msra.mxu1 %v3968_v53  ;;  %3310 = vmatprep.mubr.msk.f32.mxu1 %vm3686_vm1, %v3685_v4 }
0x2ee4   :  { %3421 = vmatprep.subr.bf16.mxu1 %v3691_v54 }
0x2ee7   :  { %3423 = vmatpush3.bf16.msra.mxu1 %v3971_v33 }
0x2ee8   :  { %3430 = vmatprep.subr.bf16.mxu1 %v3691_v54 }
0x2fb5   :  { %v2189_v3 = vpop.f32.mrb[22].mxu1 }
0x2fb6   :  { %v2194_v24 = vrot.slane %v2189_v3, 6  ;;  %v3290_v25 = vpop.f32.mrb[23].mxu1 }
0x2fb8   :  { %v2196_v26 = vadd.f32 %v2194_v24, %v3999_v6 }
0x2fba   :  { %3605 = vtanh.f32 %v2196_v26  ;;  %v3041_v13 = vmul.f32 -1.442695, %v2196_v26 }
0x2fbc   :  { %3607 = vpow2.f32 %v3041_v13 }
0x2fc4   :  { %v3606_v27 = vpop.eup %3605 }
0x2fc5   :  { %2209 = vrot.lane.b32.xlu0 %v3606_v27, %s3695_s28 }
0x2fc6   :  { %v3608_v29 = vpop.eup %3607 }
0x2fc7   :  { %v2200_v30 = vadd.f32 1.0, %v3608_v29 }
0x2fc9   :  { %3609 = vrcp.f32 %v2200_v30 }
0x2fd3   :  { %v3610_v31 = vpop.eup %3609 }
0x2fd4   :  { %v2207_v36 = vmul.f32 %v3610_v31, %v2205_v35 }
0x3037   :  { %v2210_v32 = vpop.permute.xlu0 %2209 }
0x3038   :  { %v2212_v34 = vmul.f32 %v3610_v31, %v2210_v32 }
0x303a   :  { %2214 = vrot.lane.b32.xlu1 %v2212_v34, %s3693_s2 }
0x30ac   :  { %v2215_v37 = vpop.permute.xlu1 %2214 }
0x30ad   :  { %v2217_v38 = vadd.f32 %v2215_v37, %v2207_v36 }
0x30af   :  { %3611 = vtanh.f32 %v2217_v38  ;;  %v2313_v57 = vrot.slane %v2217_v38, 6 }
0x30b9   :  { %v3612_v39 = vpop.eup %3611 }
0x30ba   :  { %2220 = vrot.lane.b32.xlu0 %v3612_v39, %s3695_s28 }
0x312c   :  { %v2221_v40 = vpop.permute.xlu0 %2220 }
0x312d   :  { %v2223_v41 = vmul.f32 %v3610_v31, %v2221_v40 }
0x312f   :  { %v2224_v43 = vmax.f32 %v2223_v41, 0.0  ;;  %v2226_v44 = vrot.slane %v2223_v41, 2 }
0x3131   :  { %2227 = vrot.lane.b32.xlu1 %v2226_v44, %s3693_s2  ;;  %v2869_v45 = vsel %vm977_vm3, %v2117_v42, %v2224_v43 }
0x31a3   :  { %v2228_v1 = vpop.permute.xlu1 %2227 }
0x31a4   :  { %3300 = vmatmul.mubr.msk.f32.vlgmr.msra.gmra.mrb[18].mxu0 %vm2019_vm6, %v2228_v1 }
0x31a5   :  { %3426 = vmatpush3.bf16.msra.mxu0 %v3968_v53  ;;  %3321 = vmatprep.mubr.msk.f32.mxu0 %vm3686_vm1, %v3685_v4 }
0x31a6   :  { %3427 = vmatprep.subr.bf16.mxu0 %v3691_v54 }
0x31a9   :  { %3429 = vmatpush3.bf16.msra.mxu0 %v3971_v33 }
0x31aa   :  { %3436 = vmatprep.subr.bf16.mxu0 %v3691_v54 }
0x3277   :  { %v2297_v46 = vpop.f32.mrb[18].mxu0 }
0x3278   :  { %v2302_v47 = vrot.slane %v2297_v46, 4  ;;  %v3301_v48 = vpop.f32.mrb[19].mxu0 }
0x327a   :  { %v2304_v49 = vadd.f32 %v2302_v47, %v3999_v6 }
0x327c   :  { %3613 = vtanh.f32 %v2304_v49  ;;  %v3043_v11 = vmul.f32 -1.442695, %v2304_v49 }
0x327e   :  { %3615 = vpow2.f32 %v3043_v11 }
0x3286   :  { %v3614_v28 = vpop.eup %3613 }
0x3287   :  { %2317 = vrot.lane.b32.xlu0 %v3614_v28, %s3695_s28 }
0x3288   :  { %v3616_v50 = vpop.eup %3615 }
0x3289   :  { %v2308_v51 = vadd.f32 1.0, %v3616_v50 }
0x328b   :  { %3617 = vrcp.f32 %v2308_v51 }
0x3295   :  { %v3618_v52 = vpop.eup %3617 }
0x3296   :  { %v2315_v58 = vmul.f32 %v3618_v52, %v2313_v57 }
0x32f9   :  { %v2318_v55 = vpop.permute.xlu0 %2317 }
0x32fa   :  { %v2320_v56 = vmul.f32 %v3618_v52, %v2318_v55 }
0x32fc   :  { %2322 = vrot.lane.b32.xlu1 %v2320_v56, %s3693_s2 }
0x336e   :  { %v2323_v59 = vpop.permute.xlu1 %2322 }
0x336f   :  { %v2325_v60 = vadd.f32 %v2323_v59, %v2315_v58 }
0x3371   :  { %3619 = vtanh.f32 %v2325_v60  ;;  %v2421_v22 = vrot.slane %v2325_v60, 6 }
0x337b   :  { %v3620_v61 = vpop.eup %3619 }
0x337c   :  { %2328 = vrot.lane.b32.xlu0 %v3620_v61, %s3695_s28 }
0x33ee   :  { %v2329_v62 = vpop.permute.xlu0 %2328 }
0x33ef   :  { %v2331_v5 = vmul.f32 %v3618_v52, %v2329_v62 }
0x33f1   :  { %v2332_v63 = vmax.f32 %v2331_v5, 0.0  ;;  %v2334_v2 = vrot.slane %v2331_v5, 4 }
0x33f3   :  { %2335 = vrot.lane.b32.xlu1 %v2334_v2, %s3693_s2  ;;  %v2870_v7 = vsel %vm979_vm4, %v2869_v45, %v2332_v63 }
0x3465   :  { %v2336_v8 = vpop.permute.xlu1 %2335 }
0x3466   :  { %3311 = vmatmul.mubr.msk.f32.vlgmr.msra.gmra.mrb[24].mxu1 %vm2019_vm6, %v2336_v8 }
0x3467   :  { %3432 = vmatpush3.bf16.msra.mxu1 %v3968_v53  ;;  %3332 = vmatprep.mubr.msk.f32.mxu1 %vm3686_vm1, %v3685_v4 }
0x3468   :  { %3433 = vmatprep.subr.bf16.mxu1 %v3691_v54 }
0x346b   :  { %3435 = vmatpush3.bf16.msra.mxu1 %v3971_v33 }
0x346c   :  { %3442 = vmatprep.subr.bf16.mxu1 %v3691_v54 }
0x3539   :  { %v2405_v9 = vpop.f32.mrb[24].mxu1 }
0x353a   :  { %v2410_v10 = vrot.slane %v2405_v9, 2  ;;  %v3312_v12 = vpop.f32.mrb[25].mxu1 }
0x353c   :  { %v2412_v14 = vadd.f32 %v2410_v10, %v3999_v6 }
0x353e   :  { %3621 = vtanh.f32 %v2412_v14  ;;  %v3045_v16 = vmul.f32 -1.442695, %v2412_v14 }
0x3540   :  { %3623 = vpow2.f32 %v3045_v16 }
0x3548   :  { %v3622_v15 = vpop.eup %3621 }
0x3549   :  { %2425 = vrot.lane.b32.xlu0 %v3622_v15, %s3695_s28 }
0x354a   :  { %v3624_v17 = vpop.eup %3623 }
0x354b   :  { %v2416_v18 = vadd.f32 1.0, %v3624_v17 }
0x354d   :  { %3625 = vrcp.f32 %v2416_v18 }
0x3557   :  { %v3626_v19 = vpop.eup %3625 }
0x3558   :  { %v2423_v23 = vmul.f32 %v3626_v19, %v2421_v22 }
0x35bb   :  { %v2426_v20 = vpop.permute.xlu0 %2425 }
0x35bc   :  { %v2428_v21 = vmul.f32 %v3626_v19, %v2426_v20 }
0x35be   :  { %2430 = vrot.lane.b32.xlu1 %v2428_v21, %s3693_s2 }
0x3630   :  { %v2431_v3 = vpop.permute.xlu1 %2430 }
0x3631   :  { %v2433_v24 = vadd.f32 %v2431_v3, %v2423_v23 }
0x3633   :  { %3627 = vtanh.f32 %v2433_v24  ;;  %v2526_v42 = vrot.slane %v2433_v24, 6 }
0x363d   :  { %v3628_v6 = vpop.eup %3627 }
0x363e   :  { %2436 = vrot.lane.b32.xlu0 %v3628_v6, %s3695_s28 }
0x36b0   :  { %v2437_v25 = vpop.permute.xlu0 %2436 }
0x36b1   :  { %v2439_v26 = vmul.f32 %v3626_v19, %v2437_v25 }
0x36b3   :  { %v2440_v27 = vmax.f32 %v2439_v26, 0.0  ;;  %v2442_v13 = vrot.slane %v2439_v26, 6 }
0x36b5   :  { %2443 = vrot.lane.b32.xlu1 %v2442_v13, %s3693_s2  ;;  %v4045_v29 = vsel %vm981_vm5, %v2870_v7, %v2440_v27 }
0x3727   :  { %v2444_v30 = vpop.permute.xlu1 %2443 }
0x3728   :  { %3322 = vmatmul.mubr.msk.f32.vlgmr.msra.gmra.mrb[20].mxu0 %vm2019_vm6, %v2444_v30 }
0x3729   :  { %3438 = vmatpush3.bf16.msra.mxu0 %v3968_v53  ;;  %3343 = vmatprep.mubr.msk.f32.mxu0 %vm3686_vm1, %v3685_v4 }
0x372a   :  { %3439 = vmatprep.subr.bf16.mxu0 %v3691_v54 }
0x372d   :  { %3441 = vmatpush3.bf16.msra.mxu0 %v3971_v33 }
0x37fb   :  { %v2513_v31 = vpop.f32.mrb[20].mxu0 }
0x37fc   :  { %v2517_v32 = vadd.f32 %v2513_v31, %v3997_v0  ;;  %v3323_v34 = vpop.f32.mrb[21].mxu0 }
0x37fe   :  { %3629 = vtanh.f32 %v2517_v32  ;;  %v3047_v36 = vmul.f32 -1.442695, %v2517_v32 }
0x3800   :  { %3631 = vpow2.f32 %v3047_v36 }
0x3808   :  { %v3630_v35 = vpop.eup %3629 }
0x3809   :  { %2530 = vrot.lane.b32.xlu0 %v3630_v35, %s3695_s28 }
0x380a   :  { %v3632_v37 = vpop.eup %3631 }
0x380b   :  { %v2521_v38 = vadd.f32 1.0, %v3632_v37 }
0x380d   :  { %3633 = vrcp.f32 %v2521_v38 }
0x3817   :  { %v3634_v39 = vpop.eup %3633 }
0x3818   :  { %v2528_v43 = vmul.f32 %v3634_v39, %v2526_v42 }
0x387b   :  { %v2531_v40 = vpop.permute.xlu0 %2530 }
0x387c   :  { %v2533_v41 = vmul.f32 %v3634_v39, %v2531_v40 }
0x387e   :  { %2535 = vrot.lane.b32.xlu1 %v2533_v41, %s3693_s2 }
0x38f0   :  { %v2536_v44 = vpop.permute.xlu1 %2535 }
0x38f1   :  { %v2538_v45 = vadd.f32 %v2536_v44, %v2528_v43 }
0x38f3   :  { %3635 = vtanh.f32 %v2538_v45 }
0x38fd   :  { %v3636_v1 = vpop.eup %3635 }
0x38fe   :  { %2541 = vrot.lane.b32.xlu0 %v3636_v1, %s3695_s28 }
0x3970   :  { %v2542_v46 = vpop.permute.xlu0 %2541 }
0x3971   :  { %v2544_v47 = vmul.f32 %v3634_v39, %v2542_v46 }
0x3973   :  { %2547 = vrot.lane.b32.xlu1 %v2544_v47, %s3693_s2  ;;  %v2545_v5 = vmax.f32 %v2544_v47, 0.0  ;;  %v22_v47 = vld [vmem:[%s4124_s1 + $0x20] sm:$0xff] }
0x39e5   :  { %v2548_v48 = vpop.permute.xlu1 %2547 }
0x39e6   :  { %3333 = vmatmul.mubr.msk.f32.vlgmr.msra.gmra.mrb[26].mxu1 %vm2019_vm6, %v2548_v48  ;;  %v23_v48 = vld [vmem:[%s4124_s1 + $0x28] sm:$0xff] }
0x39e7   :  { %3444 = vmatpush3.bf16.msra.mxu1 %v3968_v53  ;;  %3354 = vmatprep.mubr.msk.f32.mxu1 %vm3686_vm1, %v3685_v4 }
0x39e8   :  { %3445 = vmatprep.subr.bf16.mxu1 %v3691_v54  ;;  %v2633_v54 = vrot.slane %v2538_v45, 6 }
0x39eb   :  { %3447 = vmatpush3.bf16.msra.mxu1 %v3971_v33 }
0x3ab9   :  { %v2617_v49 = vpop.f32.mrb[26].mxu1 }
0x3aba   :  { %v2622_v28 = vrot.slane %v2617_v49, 6  ;;  %v3334_v11 = vpop.f32.mrb[27].mxu1  ;;  %v24_v49 = vld [vmem:[%s4124_s1 + $0x30] sm:$0xff] }
0x3abb   :  { %v25_v11 = vld [vmem:[%s4124_s1 + $0x38] sm:$0xff] }
0x3abc   :  { %v2624_v50 = vadd.f32 %v2622_v28, %v3997_v0  ;;  %v3448_v28 = vpack.c.bf16 %v23_v48, %v22_v47 }
0x3abe   :  { %3637 = vtanh.f32 %v2624_v50  ;;  %v3049_v52 = vmul.f32 -1.442695, %v2624_v50  ;;  %v3452_v50 = vpack.c.bf16 %v25_v11, %v24_v49  ;;  %3449 = vmatprep.subr.bf16.mxu0 %v3448_v28 }
0x3ac0   :  { %3639 = vpow2.f32 %v3049_v52 }
0x3ac8   :  { %v3638_v51 = vpop.eup %3637 }
0x3ac9   :  { %2637 = vrot.lane.b32.xlu0 %v3638_v51, %s3695_s28 }
0x3aca   :  { %v3640_v55 = vpop.eup %3639 }
0x3acb   :  { %v2628_v53 = vadd.f32 1.0, %v3640_v55 }
0x3acd   :  { %3641 = vrcp.f32 %v2628_v53 }
0x3ad7   :  { %v3642_v56 = vpop.eup %3641 }
0x3ad8   :  { %v2635_v33 = vmul.f32 %v3642_v56, %v2633_v54 }
0x3b3b   :  { %v2638_v4 = vpop.permute.xlu0 %2637 }
0x3b3c   :  { %v2640_v57 = vmul.f32 %v3642_v56, %v2638_v4 }
0x3b3e   :  { %2642 = vrot.lane.b32.xlu1 %v2640_v57, %s3693_s2  ;;  %v3054_v57 = vld [vmem:[%s4124_s1 + $0x40] ss:$0 sm:$0xff]  ;;  %s3661_s1 = scalar_lea.vmem %s2990_s14, 256 }
0x3b3f   :  { %p3662_p0 = scmp.ne.s32.totalorder %s2990_s14, %s3661_s1  ;;  %p3667_p2 = scmp.lt.s32.totalorder %s3661_s1, %s3661_s1 }
0x3b41   :  { %p3668_p3 = por %p3667_p2, %p3666_p1 }
0x3b43   :  { %p3669_p4 = pnand %p3668_p3, %p3662_p0 }
0x3bb0   :  { %v2643_v58 = vpop.permute.xlu1 %2642 }
0x3bb1   :  { %v2645_v59 = vadd.f32 %v2643_v58, %v2635_v33 }
0x3bb3   :  { %3643 = vtanh.f32 %v2645_v59  ;;  %v2741_v22 = vrot.slane %v2645_v59, 6 }
0x3bbd   :  { %v3644_v60 = vpop.eup %3643 }
0x3bbe   :  { %2648 = vrot.lane.b32.xlu0 %v3644_v60, %s3695_s28 }
0x3c30   :  { %v2649_v61 = vpop.permute.xlu0 %2648 }
0x3c31   :  { %v2651_v62 = vmul.f32 %v3642_v56, %v2649_v61 }
0x3c33   :  { %v2652_v63 = vmax.f32 %v2651_v62, 0.0  ;;  %v2654_v2 = vrot.slane %v2651_v62, 2 }
0x3c35   :  { %v2872_v7 = vsel %vm977_vm3, %v2545_v5, %v2652_v63  ;;  %2655 = vrot.lane.b32.xlu1 %v2654_v2, %s3693_s2 }
0x3ca7   :  { %v2656_v8 = vpop.permute.xlu1 %2655 }
0x3ca8   :  { %3344 = vmatmul.mubr.msk.f32.vlgmr.msra.gmra.mrb[22].mxu0 %vm2019_vm6, %v2656_v8 }
0x3ca9   :  { %3451 = vmatpush3.bf16.msra.mxu0 %v3448_v28 }
0x3caa   :  { %3453 = vmatprep.subr.bf16.mxu0 %v3452_v50 }
0x3cad   :  { %3455 = vmatpush3.bf16.msra.mxu0 %v3452_v50 }
0x3d7b   :  { %v2725_v9 = vpop.f32.mrb[22].mxu0 }
0x3d7c   :  { %v2730_v10 = vrot.slane %v2725_v9, 4  ;;  %v3345_v12 = vpop.f32.mrb[23].mxu0 }
0x3d7e   :  { %v2732_v14 = vadd.f32 %v2730_v10, %v3997_v0 }
0x3d80   :  { %3645 = vtanh.f32 %v2732_v14  ;;  %v3051_v16 = vmul.f32 -1.442695, %v2732_v14 }
0x3d82   :  { %3647 = vpow2.f32 %v3051_v16 }
0x3d8a   :  { %v3646_v15 = vpop.eup %3645 }
0x3d8b   :  { %2745 = vrot.lane.b32.xlu0 %v3646_v15, %s3695_s28 }
0x3d8c   :  { %v3648_v17 = vpop.eup %3647 }
0x3d8d   :  { %v2736_v18 = vadd.f32 1.0, %v3648_v17 }
0x3d8f   :  { %3649 = vrcp.f32 %v2736_v18 }
0x3d99   :  { %v3650_v19 = vpop.eup %3649 }
0x3d9a   :  { %v2743_v23 = vmul.f32 %v3650_v19, %v2741_v22 }
0x3dfd   :  { %v2746_v20 = vpop.permute.xlu0 %2745 }
0x3dfe   :  { %v2748_v21 = vmul.f32 %v3650_v19, %v2746_v20 }
0x3e00   :  { %2750 = vrot.lane.b32.xlu1 %v2748_v21, %s3693_s2 }
0x3e72   :  { %v2751_v3 = vpop.permute.xlu1 %2750 }
0x3e73   :  { %v2753_v24 = vadd.f32 %v2751_v3, %v2743_v23 }
0x3e75   :  { %3651 = vtanh.f32 %v2753_v24  ;;  %v2849_v44 = vrot.slane %v2753_v24, 6 }
0x3e7f   :  { %v3652_v6 = vpop.eup %3651 }
0x3e80   :  { %2756 = vrot.lane.b32.xlu0 %v3652_v6, %s3695_s28 }
0x3ef2   :  { %v2757_v25 = vpop.permute.xlu0 %2756 }
0x3ef3   :  { %v2759_v26 = vmul.f32 %v3650_v19, %v2757_v25 }
0x3ef5   :  { %v2760_v27 = vmax.f32 %v2759_v26, 0.0  ;;  %v2762_v13 = vrot.slane %v2759_v26, 4 }
0x3ef7   :  { %2763 = vrot.lane.b32.xlu1 %v2762_v13, %s3693_s2  ;;  %v2873_v30 = vsel %vm979_vm4, %v2872_v7, %v2760_v27 }
0x3f69   :  { %v2764_v31 = vpop.permute.xlu1 %2763 }
0x3f6a   :  { %3355 = vmatmul.mubr.msk.f32.vlgmr.msra.gmra.mrb[28].mxu1 %vm2019_vm6, %v2764_v31 }
0x403d   :  { %v2833_v32 = vpop.f32.mrb[28].mxu1 }
0x403e   :  { %v2838_v34 = vrot.slane %v2833_v32, 2  ;;  %v3356_v35 = vpop.f32.mrb[29].mxu1 }
0x4040   :  { %v2840_v36 = vadd.f32 %v2838_v34, %v3997_v0 }
0x4042   :  { %3653 = vtanh.f32 %v2840_v36  ;;  %v3053_v38 = vmul.f32 -1.442695, %v2840_v36 }
0x4044   :  { %3655 = vpow2.f32 %v3053_v38 }
0x404c   :  { %v3654_v37 = vpop.eup %3653 }
0x404d   :  { %2853 = vrot.lane.b32.xlu0 %v3654_v37, %s3695_s28 }
0x404e   :  { %v3656_v39 = vpop.eup %3655 }
0x404f   :  { %v2844_v40 = vadd.f32 1.0, %v3656_v39 }
0x4051   :  { %3657 = vrcp.f32 %v2844_v40 }
0x405b   :  { %v3658_v41 = vpop.eup %3657 }
0x405c   :  { %v2851_v45 = vmul.f32 %v3658_v41, %v2849_v44 }
0x40bf   :  { %v2854_v42 = vpop.permute.xlu0 %2853 }
0x40c0   :  { %v2856_v43 = vmul.f32 %v3658_v41, %v2854_v42 }
0x40c2   :  { %2858 = vrot.lane.b32.xlu1 %v2856_v43, %s3693_s2 }
0x40c6   :  { %2881 = vrot.lane.b32.xlu1 %v4045_v29, %s3693_s2 }
0x4134   :  { %v2859_v0 = vpop.permute.xlu1 %2858 }
0x4135   :  { %v2861_v1 = vadd.f32 %v2859_v0, %v2851_v45 }
0x4137   :  { %3659 = vtanh.f32 %v2861_v1 }
0x4138   :  { %v2882_v46 = vpop.permute.xlu1 %2881 }
0x4139   :  { %3365 = vmatprep.mubr.msk.f32.mxu0 %vm2019_vm6, %v2882_v46 }
0x4141   :  { %v3660_v51 = vpop.eup %3659 }
0x4142   :  { %2864 = vrot.lane.b32.xlu0 %v3660_v51, %s3695_s28 }
0x41b4   :  { %v2865_v52 = vpop.permute.xlu0 %2864 }
0x41b5   :  { %v2867_v55 = vmul.f32 %v3658_v41, %v2865_v52 }
0x41b7   :  { %v2868_v53 = vmax.f32 %v2867_v55, 0.0 }
0x41b9   :  { %v2874_v56 = vsel %vm981_vm5, %v2873_v30, %v2868_v53 }
0x41ba   :  { %2883 = vrot.lane.b32.xlu0 %v2874_v56, %s3693_s2 }
0x422c   :  { %v2884_v4 = vpop.permute.xlu0 %2883 }
0x422d   :  { %3366 = vmatmul.mubr.msk.f32.vlgmr.msra.gmra.mrb[24].mxu0 %vm2019_vm6, %v2884_v4 }
0x4300   :  { %v3367_v54 = vpop.f32.mrb[24].mxu0 }
0x4301   :  { %v2961_v33 = vadd.f32 %v3367_v54, %v3054_v57  ;;  %v2955_v58 = vpop.f32.mrb[25].mxu0 }
0x4302   :  { %v2956_v59 = vadd.f32 %v3054_v57, %v2955_v58 }
0x4303   :  { %2968 = vrot.lane.b32.xlu0 %v2961_v33, %s3692_s12 }
0x4304   :  { %2966 = vrot.lane.b32.xlu1 %v2956_v59, %s3692_s12 }
0x4375   :  { %v2969_v60 = vpop.permute.xlu0 %2968 }
0x4376   :  { %v2973_v61 = vmul.f32 %v2969_v60, %v2874_v56  ;;  %v2967_v62 = vpop.permute.xlu1 %2966 }
0x4377   :  { %v2972_v5 = vmul.f32 %v2967_v62, %v4045_v29 }
0x4378   :  { %2978 = vrot.lane.b32.xlu0 %v2973_v61, %s3693_s2 }
0x4379   :  { %2976 = vrot.lane.b32.xlu1 %v2972_v5, %s3693_s2 }
0x43ea   :  { %v2979_v63 = vpop.permute.xlu0 %2978 }
0x43eb   :  { %2983 = vst.msk [vmem:[#allocation2 + $0x8] sm:$0xff] %vm2019_vm6, %v2979_v63  ;;  %v2977_v2 = vpop.permute.xlu1 %2976 }
0x43ec   :  { %2982 = vst.msk [vmem:[#allocation2] sm:$0xff] %vm2019_vm6, %v2977_v2 }
0x43ed   :  { %3672 = shalt.err (!%p3669_p4)
}
0x43ee   :  { %s3673_s2 = scalar_lea.hbm %s4127_s4, 256 }
0x43ef   :  { %p3674_p5 = scmp.ne.s32.totalorder %s4127_s4, %s3673_s2  ;;  %p3677_p6 = scmp.lt.u32.totalorder %s3673_s2, %s4127_s4 }
0x43f1   :  { %p3679_p7 = pnand %p3677_p6, %p3674_p5 }
0x43f3   :  { %3682 = shalt.err (!%p3679_p7)
}
0x43f4   :  { %s3697_s20 = smov 128  }
0x43f5   :  { %2995 = dma.vmem_to_hbm [thread:$0]  %s2990_s14, 256, %s4127_s4, [#allocation3], %s3697_s20, %s3697_s20, %s3688_s27  }
0x43f6   :  { %3683 = dma.done.wait [#allocation3], 256  }
0x43f7   :  { %3684 = vsyncadd [#allocation3], 4294967040 }
0x43f8   :  { %2999 = vsyncpa [#allocation3], 1 }

</bundles_post_ra>
